<compile_context>
chip_gen: v6e
topology: v6e:2x2x1
jax: 0.10.0
libtpu: 0.0.40
codegen_flags: <defaults>
</compile_context>

<pallas_src>
from functools import partial

import numpy as np
import jax
import jax.numpy as jnp
from jax.experimental import pallas as pl
from jax.experimental.pallas import tpu as pltpu

OUT_SIZE = 224              # fixed resize target in the torch module
PATCH = 32                  # synthetic encoder patch size (224 / 32 = 7)
N_PATCH = OUT_SIZE // PATCH
PATCH_DIM = PATCH * PATCH   # 1024
ENC_DIM = 64                # synthetic encoder embedding dim
HEAD_DIM = 32               # synthetic head output dim
NUM_CLASSES = 16            # synthetic classifier classes (covers ids 0, 8, 10)

CLIP_MEAN = np.array([0.48145466, 0.4578275, 0.40821073], dtype=np.float32)
CLIP_STD = np.array([0.26862954, 0.26130258, 0.27577711], dtype=np.float32)


# ------------------------------------------------------------------- kernel --

def _clip_fused_kernel(img_ref, pry_ref, prxt_ref, scale_ref, offset_ref, sub_ref,
                       encw_ref, encb_ref, hwe_ref, hws_ref, hb_ref, cw_ref, cb_ref,
                       o_ref, embs_ref, *, multi):
    """One grid step = one crop: pooled resize + normalize + encoder.

    The last grid step additionally runs head / classifier / branch-select /
    L2-normalize, so the whole forward is a single pallas_call.
    """
    n = pl.program_id(0)
    pry = pry_ref[0]        # (PATCH, Hm)  pooled row-resize   (A @ Ry)
    prxt = prxt_ref[0]      # (Wm, PATCH)  pooled col-resize^T (Rx^T @ A^T)

    # Row-major flatten helper: mask[i, k] == 1 iff k // PATCH == i.
    # Built from iota + compares (no jnp.reshape, no integer division).
    lane = jax.lax.broadcasted_iota(jnp.int32, (PATCH, PATCH_DIM), 1)
    row = jax.lax.broadcasted_iota(jnp.int32, (PATCH, PATCH_DIM), 0)
    lo = row * PATCH
    flat_mask = ((lane >= lo) & (lane < lo + PATCH)).astype(jnp.float32)

    pflats = []
    for c in range(3):      # all channels in one grid step (unrolled)
        img_c = img_ref[0, c].astype(jnp.float32)                        # (Hm, Wm)
        t = jnp.dot(pry, img_c, preferred_element_type=jnp.float32)      # (PATCH, Wm)
        p = jnp.dot(t, prxt, preferred_element_type=jnp.float32)         # (PATCH, PATCH)
        # (x/255 - mean)/std folded to x*scale + offset; pooled weights sum to 1,
        # so the affine commutes with the pooled resize.
        p = p * scale_ref[c] + offset_ref[c]
        # (PATCH, PATCH) -> (1, PATCH_DIM) row-major flatten via tile+mask+reduce.
        rep = jnp.concatenate([p] * PATCH, axis=1)                       # (PATCH, PATCH_DIM)
        pflats.append(jnp.sum(rep * flat_mask, axis=0, keepdims=True))   # (1, PATCH_DIM)
    pflat_all = jnp.concatenate(pflats, axis=1)                          # (1, 3*PATCH_DIM)

    # Synthetic patch-embed encoder (patch-mean folded into the resize matrices).
    emb = jnp.dot(pflat_all.astype(jnp.bfloat16), encw_ref[...],
                  preferred_element_type=jnp.float32) + encb_ref[...]    # (1, ENC_DIM)

    # Store this crop's embedding into the resident scratch (select-overwrite avoids
    # a dynamic-offset store).
    row_ids = jax.lax.broadcasted_iota(jnp.int32, embs_ref.shape, 0)
    embs_ref[...] = jnp.where(row_ids == n, emb, embs_ref[...])

    @pl.when(n == pl.num_programs(0) - 1)
    def _tail():
        embs = embs_ref[...]                                             # (ncrops, ENC_DIM)
        # concat_image_info folded into the head: head([e, s]) = e@W_e + s@W_s + b.
        hws = hws_ref[...]                                               # (3, HEAD_DIM)
        hsub = (sub_ref[0] * hws[0:1, :] + sub_ref[1] * hws[1:2, :]
                + sub_ref[2] * hws[2:3, :]) + hb_ref[...]                # (1, HEAD_DIM)
        heads = jnp.dot(embs, hwe_ref[...],
                        preferred_element_type=jnp.float32) + hsub       # (ncrops, HEAD_DIM)
        if multi:
            logits = (jnp.dot(embs[0:1, :], cw_ref[...],
                              preferred_element_type=jnp.float32) + cb_ref[...])
            m = jnp.max(logits, axis=1, keepdims=True)
            idx = jax.lax.broadcasted_iota(jnp.int32, logits.shape, 1)
            cls = jnp.min(jnp.where(logits >= m, idx, jnp.int32(NUM_CLASSES)),
                          axis=1, keepdims=True)                          # first argmax
            take3 = (cls == 0) | (cls == 8) | (cls == 10)
            h12 = heads[0:1, :] + heads[1:2, :]
            h123 = h12 + heads[2:3, :]
            # Branchless select - semantically identical to the torch if/else on cls.
            feat = jnp.where(take3, h123 * (1.0 / 3.0), h12 * 0.5)
        else:
            feat = heads                                                  # (1, HEAD_DIM)
        ssq = jnp.sum(feat * feat, axis=1, keepdims=True)
        # torch F.normalize: v / max(||v||, 1e-12);  rsqrt runs on the EUP.
        o_ref[...] = feat * jax.lax.rsqrt(jnp.maximum(ssq, 1e-24))


# -------------------------------------------------------------- kernel call --

def clip_fused(imgs, prys, prxts, sub, params, multi):
    """imgs: (ncrops, 3, Hm, Wm) bf16 -> (1, HEAD_DIM) L2-normalized features."""
    ncrops, C, Hm, Wm = imgs.shape

    def full(shape):
        return pl.BlockSpec(shape, lambda n: (0,) * len(shape))

    smem = pl.BlockSpec(memory_space=pltpu.MemorySpace.SMEM)

    # TODO(synk): for large source images, tile the W (lane) axis on an extra
    # 'arbitrary' grid axis with a (PATCH, PATCH) accumulator (or raise
    # vmem_limit_bytes) so a full f32 channel stack is never double-buffered
    # (v7x: 64 MiB physical VMEM, v5e: 16 MiB default scoped limit).
    # TODO(synk): the crop axis is serialized ('arbitrary') because the tail consumes
    # all crop embeddings; on v7x with big images, split the resize over the two
    # TensorCores (core_map / tiny second call) instead.
    return pl.pallas_call(
        partial(_clip_fused_kernel, multi=multi),
        out_shape=jax.ShapeDtypeStruct((1, HEAD_DIM), jnp.float32),
        grid=(ncrops,),
        in_specs=[
            pl.BlockSpec((1, C, Hm, Wm), lambda n: (n, 0, 0, 0)),
            pl.BlockSpec((1, PATCH, Hm), lambda n: (n, 0, 0)),
            pl.BlockSpec((1, Wm, PATCH), lambda n: (n, 0, 0)),
            smem, smem, smem,
            full((3 * PATCH_DIM, ENC_DIM)),
            full((1, ENC_DIM)),
            full((ENC_DIM, HEAD_DIM)),
            full((3, HEAD_DIM)),
            full((1, HEAD_DIM)),
            full((ENC_DIM, NUM_CLASSES)),
            full((1, NUM_CLASSES)),
        ],
        out_specs=pl.BlockSpec((1, HEAD_DIM), lambda n: (0, 0)),
        scratch_shapes=[pltpu.VMEM((ncrops, ENC_DIM), jnp.float32)],
        compiler_params=pltpu.CompilerParams(
            dimension_semantics=("arbitrary",)),
    )(imgs, prys, prxts, params["scale"], params["offset"], sub,
      params["enc_w"], params["enc_b"], params["head_w_emb"],
      params["head_w_sub"], params["head_b"], params["cls_w"], params["cls_b"])


# -------------------------------------------------------------------- glue --

def _cubic(x, a=-0.5):
    x = np.abs(x)
    return np.where(
        x < 1.0, (a + 2.0) * x**3 - (a + 3.0) * x**2 + 1.0,
        np.where(x < 2.0, a * x**3 - 5.0 * a * x**2 + 8.0 * a * x - 4.0 * a, 0.0))


def resize_matrix(in_size, out_size):
    """PIL/torchvision-style separable bicubic (antialias) resampling matrix [out, in]."""
    scale = in_size / out_size
    fscale = max(scale, 1.0)
    support = 2.0 * fscale
    M = np.zeros((out_size, in_size), dtype=np.float32)
    for o in range(out_size):
        center = (o + 0.5) * scale
        xmin = max(int(center - support + 0.5), 0)
        xmax = min(int(center + support + 0.5), in_size)
        idx = np.arange(xmin, xmax)
        w = _cubic((idx - center + 0.5) / fscale).astype(np.float64)
        s = w.sum()
        if s != 0.0:
            w = w / s
        M[o, idx] = w.astype(np.float32)
    return M


def _pool_matrix():
    """A (32, 224): averages the 7x7 grid of 32x32 patches; rows sum to 1."""
    A = np.zeros((PATCH, OUT_SIZE), dtype=np.float32)
    for k in range(N_PATCH):
        A[np.arange(PATCH), k * PATCH + np.arange(PATCH)] = 1.0 / N_PATCH
    return A


def center_crop_img(img, th, tw):
    """img: (3, H, W) -> (3, th, tw), torchvision center_crop offsets."""
    _, H, W = img.shape
    top = int(round((H - th) / 2.0))
    left = int(round((W - tw) / 2.0))
    return img[:, top:top + th, left:left + tw]


def pad_to_square_img(img):
    _, H, W = img.shape
    if W > H:
        d = W - H
        return jnp.pad(img, ((0, 0), (d // 2, d - d // 2), (0, 0)))
    if W < H:
        d = H - W
        return jnp.pad(img, ((0, 0), (0, 0), (d // 2, d - d // 2)))
    return img


def build_resize_inputs(crops):
    """Stack crops (zero-padded to a common size) + per-crop pooled resize matrices.

    Images are cast to bf16 (halves the dominant image DMA); the resize matrices stay
    f32 and the image is upcast in-kernel before the f32 resize matmuls.  The padded
    columns of pry / rows of prxt are zero, so padding does not change the result.
    """
    A = _pool_matrix()
    Hm = max(int(c.shape[1]) for c in crops)
    Wm = max(int(c.shape[2]) for c in crops)
    imgs, prys, prxts = [], [], []
    # TODO(synk): zero-padding crops to (Hm, Wm) DMAs/matmuls dead rows on skewed
    # aspect ratios; per-crop extents via scalar prefetch + pl.ds would avoid it.
    for c in crops:
        Hc, Wc = int(c.shape[1]), int(c.shape[2])
        imgs.append(jnp.pad(c, ((0, 0), (0, Hm - Hc), (0, Wm - Wc)))
                    .astype(jnp.bfloat16))
        ry = resize_matrix(Hc, OUT_SIZE)            # (224, Hc)
        rx = resize_matrix(Wc, OUT_SIZE)            # (224, Wc)
        pry = A @ ry                                # (32, Hc)  pooled row-resize
        prxt = rx.T @ A.T                           # (Wc, 32)  pooled col-resize^T
        prys.append(np.pad(pry, ((0, 0), (0, Hm - Hc))))
        prxts.append(np.pad(prxt, ((0, Wm - Wc), (0, 0))))
    return (jnp.stack(imgs),
            jnp.asarray(np.stack(prys).astype(np.float32)),
            jnp.asarray(np.stack(prxts).astype(np.float32)))


def clip_forward(x, params):
    B, C, H, W = x.shape
    assert B == 1 and C == 3, "concat_image_info implies batch size 1, RGB"
    if W == H:                                      # static shapes -> ratio == 1.0
        crops = [center_crop_img(x[0], int(H * 0.9), int(W * 0.9))]
        multi = False
    else:
        xs = pad_to_square_img(x[0])
        S = max(H, W)
        crops = [
            center_crop_img(x[0], H, W),                      # ccrop_resize(x, 1.0)
            center_crop_img(xs, int(S * 0.9), int(S * 0.9)),  # pad_ccrop_resize(x, 0.9)
            center_crop_img(xs, S, S),                        # pad_ccrop_resize(x, 1.0)
        ]
        multi = True
    imgs, prys, prxts = build_resize_inputs(crops)
    sub = jnp.array([H / W, H / 224.0, W / 224.0], dtype=jnp.float32)
    return clip_fused(imgs, prys, prxts, sub, params, multi)


# ------------------------------------------------------------------- params --

def make_params(key):
    k1, k2, k3, k4, k5, k6 = jax.random.split(key, 6)
    patch_dim = 3 * PATCH_DIM
    enc_w = jax.random.normal(k1, (patch_dim, ENC_DIM), jnp.float32) * 0.02
    head_w = jax.random.normal(k3, (ENC_DIM + 3, HEAD_DIM), jnp.float32) * 0.02
    return {
        # rows ordered (c, i, j); stored bf16 (halves the largest tail DMA,
        # accumulation stays f32 in the MXU).
        "enc_w": enc_w.astype(jnp.bfloat16),
        "enc_b": jax.random.normal(k2, (1, ENC_DIM), jnp.float32) * 0.02,
        "head_w_emb": head_w[:ENC_DIM],             # (ENC_DIM, HEAD_DIM)
        "head_w_sub": head_w[ENC_DIM:],             # (3, HEAD_DIM)
        "head_b": jax.random.normal(k4, (1, HEAD_DIM), jnp.float32) * 0.02,
        "cls_w": jax.random.normal(k5, (ENC_DIM, NUM_CLASSES), jnp.float32) * 0.02,
        "cls_b": jax.random.normal(k6, (1, NUM_CLASSES), jnp.float32) * 0.02,
        # (x/255 - mean)/std folded to x*scale + offset
        "scale": jnp.asarray(1.0 / (255.0 * CLIP_STD), dtype=jnp.float32),
        "offset": jnp.asarray(-CLIP_MEAN / CLIP_STD, dtype=jnp.float32),
    }


if __name__ == "__main__":
    key = jax.random.PRNGKey(0)
    kp, kx1, kx2 = jax.random.split(key, 3)
    params = make_params(kp)
    fwd = jax.jit(clip_forward)

    # Square image -> ratio == 1.0 branch (single crop, grid=(1,)).
    x_sq = jax.random.uniform(kx1, (1, 3, 16, 16), jnp.float32, 0.0, 255.0)
    out_sq = fwd(x_sq, params)
    jax.block_until_ready(out_sq)

    # Non-square image -> classifier / multi-crop branch (3 crops, grid=(3,)).
    x_ns = jax.random.uniform(kx2, (1, 3, 16, 20), jnp.float32, 0.0, 255.0)
    out_ns = fwd(x_ns, params)
    jax.block_until_ready(out_ns)

    assert out_sq.shape == (1, HEAD_DIM) and out_ns.shape == (1, HEAD_DIM)
    assert bool(jnp.all(jnp.isfinite(out_sq))) and bool(jnp.all(jnp.isfinite(out_ns)))
    print("KERNEL_OK")
</pallas_src>

<mosaic_0001>
module attributes {stable_mosaic.version = 11 : i64} {
  func.func @_clip_fused_kernel(%arg0: i32, %arg1: memref<1x3x14x14xbf16, #tpu.memory_space<vmem>>, %arg2: memref<1x32x14xf32, #tpu.memory_space<vmem>>, %arg3: memref<1x14x32xf32, #tpu.memory_space<vmem>>, %arg4: memref<3xf32, #tpu.memory_space<smem>>, %arg5: memref<3xf32, #tpu.memory_space<smem>>, %arg6: memref<3xf32, #tpu.memory_space<smem>>, %arg7: memref<3072x64xbf16, #tpu.memory_space<vmem>>, %arg8: memref<1x64xf32, #tpu.memory_space<vmem>>, %arg9: memref<64x32xf32, #tpu.memory_space<vmem>>, %arg10: memref<3x32xf32, #tpu.memory_space<vmem>>, %arg11: memref<1x32xf32, #tpu.memory_space<vmem>>, %arg12: memref<64x16xf32, #tpu.memory_space<vmem>>, %arg13: memref<1x16xf32, #tpu.memory_space<vmem>>, %arg14: memref<1x32xf32, #tpu.memory_space<vmem>>, %arg15: memref<1x64xf32, #tpu.memory_space<vmem>>) attributes {dimension_semantics = [#tpu.dimension_semantics<arbitrary>], iteration_bounds = array<i64: 1>, scalar_prefetch = 0 : i64, scratch_operands = 1 : i64, tpu.core_type = #tpu.core_type<tc>, window_params = [{transform_indices = @transform_0, window_bounds = array<i64: 1, 3, 14, 14>}, {transform_indices = @transform_1, window_bounds = array<i64: 1, 32, 14>}, {transform_indices = @transform_2, window_bounds = array<i64: 1, 14, 32>}, {transform_indices = @transform_3, window_bounds = array<i64: 3>}, {transform_indices = @transform_4, window_bounds = array<i64: 3>}, {transform_indices = @transform_5, window_bounds = array<i64: 3>}, {pipeline_mode = #tpu.pipeline_mode<synchronous>, transform_indices = @transform_6, window_bounds = array<i64: 3072, 64>}, {pipeline_mode = #tpu.pipeline_mode<synchronous>, transform_indices = @transform_7, window_bounds = array<i64: 1, 64>}, {pipeline_mode = #tpu.pipeline_mode<synchronous>, transform_indices = @transform_8, window_bounds = array<i64: 64, 32>}, {pipeline_mode = #tpu.pipeline_mode<synchronous>, transform_indices = @transform_9, window_bounds = array<i64: 3, 32>}, {pipeline_mode = #tpu.pipeline_mode<synchronous>, transform_indices = @transform_10, window_bounds = array<i64: 1, 32>}, {pipeline_mode = #tpu.pipeline_mode<synchronous>, transform_indices = @transform_11, window_bounds = array<i64: 64, 16>}, {pipeline_mode = #tpu.pipeline_mode<synchronous>, transform_indices = @transform_12, window_bounds = array<i64: 1, 16>}, {pipeline_mode = #tpu.pipeline_mode<synchronous>, transform_indices = @transform_13, window_bounds = array<i64: 1, 32>}]} {
    %c0 = arith.constant 0 : index
    %c0_0 = arith.constant 0 : index
    %c0_1 = arith.constant 0 : index
    %0 = vector.load %arg2[%c0, %c0_0, %c0_1] : memref<1x32x14xf32, #tpu.memory_space<vmem>>, vector<1x32x14xf32>
    %1 = vector.shape_cast %0 : vector<1x32x14xf32> to vector<32x14xf32>
    %c0_2 = arith.constant 0 : index
    %c0_3 = arith.constant 0 : index
    %c0_4 = arith.constant 0 : index
    %2 = vector.load %arg3[%c0_2, %c0_3, %c0_4] : memref<1x14x32xf32, #tpu.memory_space<vmem>>, vector<1x14x32xf32>
    %3 = vector.shape_cast %2 : vector<1x14x32xf32> to vector<14x32xf32>
    %4 = tpu.iota {dimensions = array<i32: 1>} : vector<32x1024xi32>
    %5 = tpu.iota {dimensions = array<i32: 0>} : vector<32x1024xi32>
    %c32_i32 = arith.constant 32 : i32
    %6 = vector.broadcast %c32_i32 : i32 to vector<32x1024xi32>
    %7 = arith.muli %5, %6 : vector<32x1024xi32>
    %8 = arith.cmpi sge, %4, %7 : vector<32x1024xi32>
    %c32_i32_5 = arith.constant 32 : i32
    %9 = vector.broadcast %c32_i32_5 : i32 to vector<32x1024xi32>
    %10 = arith.addi %7, %9 : vector<32x1024xi32>
    %11 = arith.cmpi slt, %4, %10 : vector<32x1024xi32>
    %12 = arith.andi %8, %11 : vector<32x1024xi1>
    %13 = arith.extui %12 : vector<32x1024xi1> to vector<32x1024xi32>
    %14 = arith.sitofp %13 : vector<32x1024xi32> to vector<32x1024xf32>
    %c0_6 = arith.constant 0 : index
    %c0_7 = arith.constant 0 : index
    %c0_8 = arith.constant 0 : index
    %c0_9 = arith.constant 0 : index
    %15 = vector.load %arg1[%c0_6, %c0_7, %c0_8, %c0_9] : memref<1x3x14x14xbf16, #tpu.memory_space<vmem>>, vector<1x1x14x14xbf16>
    %16 = vector.shape_cast %15 : vector<1x1x14x14xbf16> to vector<14x14xbf16>
    %17 = arith.extf %16 : vector<14x14xbf16> to vector<14x14xf32>
    %cst = arith.constant dense<0.000000e+00> : vector<32x14xf32>
    %18 = tpu.matmul %1, %17, %cst {dimension_numbers = #tpu.dot_dimension_numbers<[1], [0], [0], [1], [0, 0, 1, 1], [], []>} : vector<32x14xf32>, vector<14x14xf32>, vector<32x14xf32> -> vector<32x14xf32>
    %cst_10 = arith.constant dense<0.000000e+00> : vector<32x32xf32>
    %19 = tpu.matmul %18, %3, %cst_10 {dimension_numbers = #tpu.dot_dimension_numbers<[1], [0], [0], [1], [0, 0, 1, 1], [], []>} : vector<32x14xf32>, vector<14x32xf32>, vector<32x32xf32> -> vector<32x32xf32>
    %c0_11 = arith.constant 0 : index
    %20 = memref.load %arg4[%c0_11] : memref<3xf32, #tpu.memory_space<smem>>
    %21 = vector.broadcast %20 : f32 to vector<32x32xf32>
    %22 = arith.mulf %19, %21 : vector<32x32xf32>
    %c0_12 = arith.constant 0 : index
    %23 = memref.load %arg5[%c0_12] : memref<3xf32, #tpu.memory_space<smem>>
    %24 = vector.broadcast %23 : f32 to vector<32x32xf32>
    %25 = arith.addf %22, %24 : vector<32x32xf32>
    %26 = tpu.concatenate %25, %25, %25, %25, %25, %25, %25, %25, %25, %25, %25, %25, %25, %25, %25, %25 in 1 : vector<32x32xf32>, vector<32x32xf32>, vector<32x32xf32>, vector<32x32xf32>, vector<32x32xf32>, vector<32x32xf32>, vector<32x32xf32>, vector<32x32xf32>, vector<32x32xf32>, vector<32x32xf32>, vector<32x32xf32>, vector<32x32xf32>, vector<32x32xf32>, vector<32x32xf32>, vector<32x32xf32>, vector<32x32xf32> -> vector<32x512xf32>
    %27 = tpu.concatenate %25, %25, %25, %25, %25, %25, %25, %25, %25, %25, %25, %25, %25, %25, %25, %25 in 1 : vector<32x32xf32>, vector<32x32xf32>, vector<32x32xf32>, vector<32x32xf32>, vector<32x32xf32>, vector<32x32xf32>, vector<32x32xf32>, vector<32x32xf32>, vector<32x32xf32>, vector<32x32xf32>, vector<32x32xf32>, vector<32x32xf32>, vector<32x32xf32>, vector<32x32xf32>, vector<32x32xf32>, vector<32x32xf32> -> vector<32x512xf32>
    %28 = tpu.concatenate %26, %27 in 1 : vector<32x512xf32>, vector<32x512xf32> -> vector<32x1024xf32>
    %29 = arith.mulf %28, %14 : vector<32x1024xf32>
    %cst_13 = arith.constant dense<0.000000e+00> : vector<1024xf32>
    %30 = vector.multi_reduction <add>, %29, %cst_13 [0] : vector<32x1024xf32> to vector<1024xf32>
    %31 = vector.shape_cast %30 : vector<1024xf32> to vector<1x1024xf32>
    %c0_14 = arith.constant 0 : index
    %c1 = arith.constant 1 : index
    %c0_15 = arith.constant 0 : index
    %c0_16 = arith.constant 0 : index
    %32 = vector.load %arg1[%c0_14, %c1, %c0_15, %c0_16] : memref<1x3x14x14xbf16, #tpu.memory_space<vmem>>, vector<1x1x14x14xbf16>
    %33 = vector.shape_cast %32 : vector<1x1x14x14xbf16> to vector<14x14xbf16>
    %34 = arith.extf %33 : vector<14x14xbf16> to vector<14x14xf32>
    %cst_17 = arith.constant dense<0.000000e+00> : vector<32x14xf32>
    %35 = tpu.matmul %1, %34, %cst_17 {dimension_numbers = #tpu.dot_dimension_numbers<[1], [0], [0], [1], [0, 0, 1, 1], [], []>} : vector<32x14xf32>, vector<14x14xf32>, vector<32x14xf32> -> vector<32x14xf32>
    %cst_18 = arith.constant dense<0.000000e+00> : vector<32x32xf32>
    %36 = tpu.matmul %35, %3, %cst_18 {dimension_numbers = #tpu.dot_dimension_numbers<[1], [0], [0], [1], [0, 0, 1, 1], [], []>} : vector<32x14xf32>, vector<14x32xf32>, vector<32x32xf32> -> vector<32x32xf32>
    %c1_19 = arith.constant 1 : index
    %37 = memref.load %arg4[%c1_19] : memref<3xf32, #tpu.memory_space<smem>>
    %38 = vector.broadcast %37 : f32 to vector<32x32xf32>
    %39 = arith.mulf %36, %38 : vector<32x32xf32>
    %c1_20 = arith.constant 1 : index
    %40 = memref.load %arg5[%c1_20] : memref<3xf32, #tpu.memory_space<smem>>
    %41 = vector.broadcast %40 : f32 to vector<32x32xf32>
    %42 = arith.addf %39, %41 : vector<32x32xf32>
    %43 = tpu.concatenate %42, %42, %42, %42, %42, %42, %42, %42, %42, %42, %42, %42, %42, %42, %42, %42 in 1 : vector<32x32xf32>, vector<32x32xf32>, vector<32x32xf32>, vector<32x32xf32>, vector<32x32xf32>, vector<32x32xf32>, vector<32x32xf32>, vector<32x32xf32>, vector<32x32xf32>, vector<32x32xf32>, vector<32x32xf32>, vector<32x32xf32>, vector<32x32xf32>, vector<32x32xf32>, vector<32x32xf32>, vector<32x32xf32> -> vector<32x512xf32>
    %44 = tpu.concatenate %42, %42, %42, %42, %42, %42, %42, %42, %42, %42, %42, %42, %42, %42, %42, %42 in 1 : vector<32x32xf32>, vector<32x32xf32>, vector<32x32xf32>, vector<32x32xf32>, vector<32x32xf32>, vector<32x32xf32>, vector<32x32xf32>, vector<32x32xf32>, vector<32x32xf32>, vector<32x32xf32>, vector<32x32xf32>, vector<32x32xf32>, vector<32x32xf32>, vector<32x32xf32>, vector<32x32xf32>, vector<32x32xf32> -> vector<32x512xf32>
    %45 = tpu.concatenate %43, %44 in 1 : vector<32x512xf32>, vector<32x512xf32> -> vector<32x1024xf32>
    %46 = arith.mulf %45, %14 : vector<32x1024xf32>
    %cst_21 = arith.constant dense<0.000000e+00> : vector<1024xf32>
    %47 = vector.multi_reduction <add>, %46, %cst_21 [0] : vector<32x1024xf32> to vector<1024xf32>
    %48 = vector.shape_cast %47 : vector<1024xf32> to vector<1x1024xf32>
    %c0_22 = arith.constant 0 : index
    %c2 = arith.constant 2 : index
    %c0_23 = arith.constant 0 : index
    %c0_24 = arith.constant 0 : index
    %49 = vector.load %arg1[%c0_22, %c2, %c0_23, %c0_24] : memref<1x3x14x14xbf16, #tpu.memory_space<vmem>>, vector<1x1x14x14xbf16>
    %50 = vector.shape_cast %49 : vector<1x1x14x14xbf16> to vector<14x14xbf16>
    %51 = arith.extf %50 : vector<14x14xbf16> to vector<14x14xf32>
    %cst_25 = arith.constant dense<0.000000e+00> : vector<32x14xf32>
    %52 = tpu.matmul %1, %51, %cst_25 {dimension_numbers = #tpu.dot_dimension_numbers<[1], [0], [0], [1], [0, 0, 1, 1], [], []>} : vector<32x14xf32>, vector<14x14xf32>, vector<32x14xf32> -> vector<32x14xf32>
    %cst_26 = arith.constant dense<0.000000e+00> : vector<32x32xf32>
    %53 = tpu.matmul %52, %3, %cst_26 {dimension_numbers = #tpu.dot_dimension_numbers<[1], [0], [0], [1], [0, 0, 1, 1], [], []>} : vector<32x14xf32>, vector<14x32xf32>, vector<32x32xf32> -> vector<32x32xf32>
    %c2_27 = arith.constant 2 : index
    %54 = memref.load %arg4[%c2_27] : memref<3xf32, #tpu.memory_space<smem>>
    %55 = vector.broadcast %54 : f32 to vector<32x32xf32>
    %56 = arith.mulf %53, %55 : vector<32x32xf32>
    %c2_28 = arith.constant 2 : index
    %57 = memref.load %arg5[%c2_28] : memref<3xf32, #tpu.memory_space<smem>>
    %58 = vector.broadcast %57 : f32 to vector<32x32xf32>
    %59 = arith.addf %56, %58 : vector<32x32xf32>
    %60 = tpu.concatenate %59, %59, %59, %59, %59, %59, %59, %59, %59, %59, %59, %59, %59, %59, %59, %59 in 1 : vector<32x32xf32>, vector<32x32xf32>, vector<32x32xf32>, vector<32x32xf32>, vector<32x32xf32>, vector<32x32xf32>, vector<32x32xf32>, vector<32x32xf32>, vector<32x32xf32>, vector<32x32xf32>, vector<32x32xf32>, vector<32x32xf32>, vector<32x32xf32>, vector<32x32xf32>, vector<32x32xf32>, vector<32x32xf32> -> vector<32x512xf32>
    %61 = tpu.concatenate %59, %59, %59, %59, %59, %59, %59, %59, %59, %59, %59, %59, %59, %59, %59, %59 in 1 : vector<32x32xf32>, vector<32x32xf32>, vector<32x32xf32>, vector<32x32xf32>, vector<32x32xf32>, vector<32x32xf32>, vector<32x32xf32>, vector<32x32xf32>, vector<32x32xf32>, vector<32x32xf32>, vector<32x32xf32>, vector<32x32xf32>, vector<32x32xf32>, vector<32x32xf32>, vector<32x32xf32>, vector<32x32xf32> -> vector<32x512xf32>
    %62 = tpu.concatenate %60, %61 in 1 : vector<32x512xf32>, vector<32x512xf32> -> vector<32x1024xf32>
    %63 = arith.mulf %62, %14 : vector<32x1024xf32>
    %cst_29 = arith.constant dense<0.000000e+00> : vector<1024xf32>
    %64 = vector.multi_reduction <add>, %63, %cst_29 [0] : vector<32x1024xf32> to vector<1024xf32>
    %65 = vector.shape_cast %64 : vector<1024xf32> to vector<1x1024xf32>
    %66 = tpu.concatenate %31, %48, %65 in 1 : vector<1x1024xf32>, vector<1x1024xf32>, vector<1x1024xf32> -> vector<1x3072xf32>
    %67 = arith.truncf %66 : vector<1x3072xf32> to vector<1x3072xbf16>
    %c0_30 = arith.constant 0 : index
    %c0_31 = arith.constant 0 : index
    %68 = vector.load %arg7[%c0_30, %c0_31] : memref<3072x64xbf16, #tpu.memory_space<vmem>>, vector<3072x64xbf16>
    %cst_32 = arith.constant dense<0.000000e+00> : vector<1x64xf32>
    %69 = tpu.matmul %67, %68, %cst_32 {dimension_numbers = #tpu.dot_dimension_numbers<[1], [0], [0], [1], [0, 0, 1, 1], [], []>} : vector<1x3072xbf16>, vector<3072x64xbf16>, vector<1x64xf32> -> vector<1x64xf32>
    %c0_33 = arith.constant 0 : index
    %c0_34 = arith.constant 0 : index
    %70 = vector.load %arg8[%c0_33, %c0_34] : memref<1x64xf32, #tpu.memory_space<vmem>>, vector<1x64xf32>
    %71 = arith.addf %69, %70 : vector<1x64xf32>
    %72 = tpu.iota {dimensions = array<i32: 0>} : vector<1x64xi32>
    %73 = vector.broadcast %arg0 : i32 to vector<1x64xi32>
    %74 = arith.cmpi eq, %72, %73 : vector<1x64xi32>
    %c0_35 = arith.constant 0 : index
    %c0_36 = arith.constant 0 : index
    %75 = vector.load %arg15[%c0_35, %c0_36] : memref<1x64xf32, #tpu.memory_space<vmem>>, vector<1x64xf32>
    %76 = arith.select %74, %71, %75 : vector<1x64xi1>, vector<1x64xf32>
    %c0_37 = arith.constant 0 : index
    %c0_38 = arith.constant 0 : index
    %77 = vector.load %arg15[%c0_37, %c0_38] : memref<1x64xf32, #tpu.memory_space<vmem>>, vector<1x64xf32>
    tpu.vector_store %arg15[%c0_37, %c0_38], %76 {strides = array<i32>} : memref<1x64xf32, #tpu.memory_space<vmem>>, vector<1x64xf32>,
    %c0_i32 = arith.constant 0 : i32
    %78 = arith.cmpi eq, %arg0, %c0_i32 : i32
    %79 = arith.extui %78 : i1 to i32
    %c0_i32_39 = arith.constant 0 : i32
    %80 = arith.cmpi ne, %79, %c0_i32_39 : i32
    scf.if %80 {
      %c0_40 = arith.constant 0 : index
      %c0_41 = arith.constant 0 : index
      %81 = vector.load %arg15[%c0_40, %c0_41] : memref<1x64xf32, #tpu.memory_space<vmem>>, vector<1x64xf32>
      %c0_42 = arith.constant 0 : index
      %c0_43 = arith.constant 0 : index
      %82 = vector.load %arg10[%c0_42, %c0_43] : memref<3x32xf32, #tpu.memory_space<vmem>>, vector<3x32xf32>
      %c0_44 = arith.constant 0 : index
      %83 = memref.load %arg6[%c0_44] : memref<3xf32, #tpu.memory_space<smem>>
      %84 = vector.extract_strided_slice %82 {offsets = [0, 0], sizes = [1, 32], strides = [1, 1]} : vector<3x32xf32> to vector<1x32xf32>
      %85 = vector.broadcast %83 : f32 to vector<1x32xf32>
      %86 = arith.mulf %85, %84 : vector<1x32xf32>
      %c1_45 = arith.constant 1 : index
      %87 = memref.load %arg6[%c1_45] : memref<3xf32, #tpu.memory_space<smem>>
      %88 = vector.extract_strided_slice %82 {offsets = [1, 0], sizes = [1, 32], strides = [1, 1]} : vector<3x32xf32> to vector<1x32xf32>
      %89 = vector.broadcast %87 : f32 to vector<1x32xf32>
      %90 = arith.mulf %89, %88 : vector<1x32xf32>
      %91 = arith.addf %86, %90 : vector<1x32xf32>
      %c2_46 = arith.constant 2 : index
      %92 = memref.load %arg6[%c2_46] : memref<3xf32, #tpu.memory_space<smem>>
      %93 = vector.extract_strided_slice %82 {offsets = [2, 0], sizes = [1, 32], strides = [1, 1]} : vector<3x32xf32> to vector<1x32xf32>
      %94 = vector.broadcast %92 : f32 to vector<1x32xf32>
      %95 = arith.mulf %94, %93 : vector<1x32xf32>
      %96 = arith.addf %91, %95 : vector<1x32xf32>
      %c0_47 = arith.constant 0 : index
      %c0_48 = arith.constant 0 : index
      %97 = vector.load %arg11[%c0_47, %c0_48] : memref<1x32xf32, #tpu.memory_space<vmem>>, vector<1x32xf32>
      %98 = arith.addf %96, %97 : vector<1x32xf32>
      %c0_49 = arith.constant 0 : index
      %c0_50 = arith.constant 0 : index
      %99 = vector.load %arg9[%c0_49, %c0_50] : memref<64x32xf32, #tpu.memory_space<vmem>>, vector<64x32xf32>
      %cst_51 = arith.constant dense<0.000000e+00> : vector<1x32xf32>
      %100 = tpu.matmul %81, %99, %cst_51 {dimension_numbers = #tpu.dot_dimension_numbers<[1], [0], [0], [1], [0, 0, 1, 1], [], []>} : vector<1x64xf32>, vector<64x32xf32>, vector<1x32xf32> -> vector<1x32xf32>
      %101 = arith.addf %100, %98 : vector<1x32xf32>
      %102 = arith.mulf %101, %101 : vector<1x32xf32>
      %cst_52 = arith.constant dense<0.000000e+00> : vector<1xf32>
      %103 = vector.multi_reduction <add>, %102, %cst_52 [1] : vector<1x32xf32> to vector<1xf32>
      %104 = vector.shape_cast %103 : vector<1xf32> to vector<1x1xf32>
      %cst_53 = arith.constant 1.000000e-24 : f32
      %105 = vector.broadcast %cst_53 : f32 to vector<1x1xf32>
      %106 = arith.maximumf %104, %105 : vector<1x1xf32>
      %107 = math.rsqrt %106 : vector<1x1xf32>
      %108 = vector.broadcast %107 : vector<1x1xf32> to vector<1x32xf32>
      %109 = arith.mulf %101, %108 : vector<1x32xf32>
      %c0_54 = arith.constant 0 : index
      %c0_55 = arith.constant 0 : index
      %110 = vector.load %arg14[%c0_54, %c0_55] : memref<1x32xf32, #tpu.memory_space<vmem>>, vector<1x32xf32>
      tpu.vector_store %arg14[%c0_54, %c0_55], %109 {strides = array<i32>} : memref<1x32xf32, #tpu.memory_space<vmem>>, vector<1x32xf32>,
    } else {
    }
    return
  }
  func.func @transform_0(%arg0: i32) -> (i32, i32, i32, i32) {
    %c0_i32 = arith.constant 0 : i32
    %c0_i32_0 = arith.constant 0 : i32
    %c0_i32_1 = arith.constant 0 : i32
    %c0_i32_2 = arith.constant 0 : i32
    return %arg0, %c0_i32, %c0_i32_0, %c0_i32_1 : i32, i32, i32, i32
  }
  func.func @transform_1(%arg0: i32) -> (i32, i32, i32) {
    %c0_i32 = arith.constant 0 : i32
    %c0_i32_0 = arith.constant 0 : i32
    %c0_i32_1 = arith.constant 0 : i32
    return %arg0, %c0_i32, %c0_i32_0 : i32, i32, i32
  }
  func.func @transform_2(%arg0: i32) -> (i32, i32, i32) {
    %c0_i32 = arith.constant 0 : i32
    %c0_i32_0 = arith.constant 0 : i32
    %c0_i32_1 = arith.constant 0 : i32
    return %arg0, %c0_i32, %c0_i32_0 : i32, i32, i32
  }
  func.func @transform_3(%arg0: i32) -> i32 {
    %c0_i32 = arith.constant 0 : i32
    %c0_i32_0 = arith.constant 0 : i32
    return %c0_i32 : i32
  }
  func.func @transform_4(%arg0: i32) -> i32 {
    %c0_i32 = arith.constant 0 : i32
    %c0_i32_0 = arith.constant 0 : i32
    return %c0_i32 : i32
  }
  func.func @transform_5(%arg0: i32) -> i32 {
    %c0_i32 = arith.constant 0 : i32
    %c0_i32_0 = arith.constant 0 : i32
    return %c0_i32 : i32
  }
  func.func @transform_6(%arg0: i32) -> (i32, i32) {
    %c0_i32 = arith.constant 0 : i32
    %c0_i32_0 = arith.constant 0 : i32
    %c0_i32_1 = arith.constant 0 : i32
    return %c0_i32, %c0_i32_0 : i32, i32
  }
  func.func @transform_7(%arg0: i32) -> (i32, i32) {
    %c0_i32 = arith.constant 0 : i32
    %c0_i32_0 = arith.constant 0 : i32
    %c0_i32_1 = arith.constant 0 : i32
    return %c0_i32, %c0_i32_0 : i32, i32
  }
  func.func @transform_8(%arg0: i32) -> (i32, i32) {
    %c0_i32 = arith.constant 0 : i32
    %c0_i32_0 = arith.constant 0 : i32
    %c0_i32_1 = arith.constant 0 : i32
    return %c0_i32, %c0_i32_0 : i32, i32
  }
  func.func @transform_9(%arg0: i32) -> (i32, i32) {
    %c0_i32 = arith.constant 0 : i32
    %c0_i32_0 = arith.constant 0 : i32
    %c0_i32_1 = arith.constant 0 : i32
    return %c0_i32, %c0_i32_0 : i32, i32
  }
  func.func @transform_10(%arg0: i32) -> (i32, i32) {
    %c0_i32 = arith.constant 0 : i32
    %c0_i32_0 = arith.constant 0 : i32
    %c0_i32_1 = arith.constant 0 : i32
    return %c0_i32, %c0_i32_0 : i32, i32
  }
  func.func @transform_11(%arg0: i32) -> (i32, i32) {
    %c0_i32 = arith.constant 0 : i32
    %c0_i32_0 = arith.constant 0 : i32
    %c0_i32_1 = arith.constant 0 : i32
    return %c0_i32, %c0_i32_0 : i32, i32
  }
  func.func @transform_12(%arg0: i32) -> (i32, i32) {
    %c0_i32 = arith.constant 0 : i32
    %c0_i32_0 = arith.constant 0 : i32
    %c0_i32_1 = arith.constant 0 : i32
    return %c0_i32, %c0_i32_0 : i32, i32
  }
  func.func @transform_13(%arg0: i32) -> (i32, i32) {
    %c0_i32 = arith.constant 0 : i32
    %c0_i32_0 = arith.constant 0 : i32
    %c0_i32_1 = arith.constant 0 : i32
    return %c0_i32, %c0_i32_0 : i32, i32
  }
}

</mosaic_0001>

<bundles_post_ra>
// kernel: clip_forward.1
= control target key start
LH: loop header
LB: loop body
LE: loop exit
PB: predicated region body
PF: predicated region fallthrough
CT: control target
= control target key end

     0   :  { %18 = vsyncpa [#allocation5], 0  ;;  %s6267_s0 = inlined_call_operand.vmem [shape: bf16[1,3,14,14], index: 0, kind: input, shape index: {}]   ;;  %s6268_s1 = inlined_call_operand.vmem [shape: f32[1,32,14], index: 1, kind: input, shape index: {}]   ;;  %s6269_s2 = inlined_call_operand.vmem [shape: f32[1,14,32], index: 2, kind: input, shape index: {}]   ;;  %s6270_s3 = inlined_call_operand.vmem [shape: f32[3], index: 3, kind: input, shape index: {}]   ;;  %s6271_s4 = inlined_call_operand.vmem [shape: f32[3], index: 4, kind: input, shape index: {}]   ;;  %s6272_s5 = inlined_call_operand.vmem [shape: f32[3], index: 5, kind: input, shape index: {}]   ;;  %s6273_s6 = inlined_call_operand.vmem [shape: bf16[3072,64], index: 6, kind: input, shape index: {}]   ;;  %s6274_s7 = inlined_call_operand.vmem [shape: f32[1,64], index: 7, kind: input, shape index: {}]   ;;  %s6275_s8 = inlined_call_operand.vmem [shape: f32[64,32], index: 8, kind: input, shape index: {}]   ;;  %s6276_s9 = inlined_call_operand.vmem [shape: f32[3,32], index: 9, kind: input, shape index: {}]   ;;  %s6277_s10 = inlined_call_operand.vmem [shape: f32[1,32], index: 10, kind: input, shape index: {}]   ;;  %s6278_s11 = inlined_call_operand.vmem [shape: f32[64,16], index: 11, kind: input, shape index: {}]   ;;  %s6279_s12 = inlined_call_operand.vmem [shape: f32[1,16], index: 12, kind: input, shape index: {}]   ;;  %s6280_s13 = inlined_call_operand.hbm [shape: f32[1,32], index: 13, kind: output, shape index: {}]  }
   0x1   :  { %19 = vsyncpa [#allocation7], 0  ;;  %s43_s27 = sshll.u32 %s6271_s4, 4  ;;  %s44_s27 = int_to_ptr.vmem [resolvable:$true] %s43_s27 }
   0x2   :  { %20 = vsyncpa [#allocation4], 0  ;;  %s33_s30 = sshll.u32 %s6270_s3, 4  ;;  %s4397_s14 = scalar_lea.vmem %s44_s27, 16  ;;  %s34_s30 = int_to_ptr.vmem [resolvable:$true] %s33_s30 }
   0x3   :  { %p4398_p0 = scmp.ne.s32.totalorder %s44_s27, %s4397_s14  ;;  %p4402_p1 = scmp.lt.s32.totalorder %s44_s27, %s44_s27 }
   0x4   :  { %p4403_p2 = scmp.lt.s32.totalorder %s4397_s14, %s4397_s14 }
   0x6   :  { %p4404_p3 = por %p4403_p2, %p4402_p1 }
   0x8   :  { %p4405_p4 = pnand %p4404_p3, %p4398_p0 }
   0xa   :  { %4408 = shalt.err (!%p4405_p4)
}
   0xb   :  { %s4459_s11 = smov [#allocation6]   ;;  %s4409_s12 = scalar_lea.vmem %s34_s30, 16 }
   0xc   :  { %46 = dma.vmem_to_smem %s44_s27, 16, %s4459_s11, [#allocation7]  }
   0xd   :  { %p4410_p5 = scmp.ne.s32.totalorder %s34_s30, %s4409_s12  ;;  %p4414_p6 = scmp.lt.s32.totalorder %s34_s30, %s34_s30 }
   0xe   :  { %p4415_p7 = scmp.lt.s32.totalorder %s4409_s12, %s4409_s12 }
  0x10   :  { %p4416_p8 = por %p4415_p7, %p4414_p6 }
  0x12   :  { %p4417_p9 = pnand %p4416_p8, %p4410_p5 }
  0x14   :  { %4420 = shalt.err (!%p4417_p9)
}
  0x15   :  { %s4460_s4 = smov [#allocation3]   ;;  %s53_s16 = sshll.u32 %s6272_s5, 4  ;;  %s54_s16 = int_to_ptr.vmem [resolvable:$true] %s53_s16 }
  0x16   :  { %36 = dma.vmem_to_smem %s34_s30, 16, %s4460_s4, [#allocation5]  }
  0x17   :  { %s4421_s17 = scalar_lea.vmem %s54_s16, 16  ;;  %p4426_p11 = scmp.lt.s32.totalorder %s54_s16, %s54_s16 }
  0x18   :  { %p4422_p10 = scmp.ne.s32.totalorder %s54_s16, %s4421_s17  ;;  %p4427_p12 = scmp.lt.s32.totalorder %s4421_s17, %s4421_s17 }
  0x1a   :  { %p4428_p13 = por %p4427_p12, %p4426_p11 }
  0x1c   :  { %p4429_p0 = pnand %p4428_p13, %p4422_p10 }
  0x1e   :  { %4432 = shalt.err (!%p4429_p0)
}
  0x1f   :  { %s4461_s18 = smov [#allocation8]  }
  0x20   :  { %56 = dma.vmem_to_smem %s54_s16, 16, %s4461_s18, [#allocation7]  }
  0x21   :  { %4453 = dma.done.wait [#allocation5], 16  }
  0x22   :  { %4454 = vsyncadd [#allocation5], 4294967280 }
  0x23   :  { %4455 = dma.done.wait [#allocation7], 32  }
  0x24   :  { %4456 = vsyncadd [#allocation7], 4294967264 }
  0x25   :  { %80 = sfence }
  0x26   :  { %v271_v0 = vld [vmem:[%s6267_s0 + $0x4] sm:$0x7]  ;;  %vm287_vm0 = vcmask 1045504   ;;  %v270_v1 = vld [vmem:[%s6267_s0] ss:$8 sps:$4 sm:$0xff]   ;;  %vm274_vm1 = vcmask 113664  }
  0x27   :  { %v82_v2 = vld [vmem:[%s6268_s1] sm:$0xff]  ;;  %v273_v3 = vunpack.c.l.bf16 %v271_v0  ;;  %v272_v4 = vunpack.c.l.bf16 %v270_v1  ;;  %v83_v5 = vld [vmem:[%s6268_s1 + $0x8] sm:$0xff]  ;;  %v3598_v7 = vld [vmem:[%s6267_s0 + $0x14] sm:$0x7]  ;;  %v650_v10 = vunpack.c.h.bf16 %v270_v1  ;;  %s4462_s12 = smov 64   ;;  %s4463_s4 = smov 32  }
  0x28   :  { %4119 = vmatprep.mubr.msk.f32.mxu1 %vm274_vm1, %v82_v2  ;;  %v3584_v6 = vld [vmem:[%s6267_s0 + $0xc] sm:$0x7]  ;;  %4139 = vmatprep.mubr.msk.f32.mxu0 %vm274_vm1, %v82_v2  ;;  %v84_v8 = vld [vmem:[%s6268_s1 + $0x10] sm:$0xff]  ;;  %v1009_v12 = vunpack.c.l.bf16 %v3598_v7  ;;  %v85_v13 = vld [vmem:[%s6268_s1 + $0x18] sm:$0xff]  ;;  %s476_s1 = sld [smem:[#allocation3]]  ;;  %s4464_s19 = smov 96  }
  0x29   :  { %4115 = vmatprep.subr.msk.mxu1 %vm287_vm0, %v273_v3  ;;  %v651_v9 = vunpack.c.l.bf16 %v3584_v6  ;;  %v3597_v11 = vld [vmem:[%s6267_s0 + $0x10] sm:$0xf]  ;;  %v87_v15 = vld [vmem:[%s6269_s2 + $0x8] sm:$0x3f]  ;;  %v86_v16 = vld [vmem:[%s6269_s2] sm:$0xff]  ;;  %s482_s2 = sld [smem:[#allocation6]] }
  0x2a   :  { %4116 = vmatpush3.msk.msra.mxu1 %vm287_vm0, %v273_v3  ;;  %v1008_v14 = vunpack.c.l.bf16 %v3597_v11  ;;  %v4203_v30 = vld [vmem:[%s6273_s6 + $0x78] sm:$0xff]   ;;  %v4207_v38 = vld [vmem:[%s6273_s6 + $0x70] sm:$0xff]   ;;  %v4211_v45 = vld [vmem:[%s6273_s6 + $0x68] sm:$0xff]   ;;  %s3595_s20 = sld [smem:[#allocation3 + $0x1]] }
  0x2b   :  { %4117 = vmatprep.subr.mxu1 %v272_v4  ;;  %4135 = vmatprep.subr.msk.mxu0 %vm287_vm0, %v651_v9  ;;  %v4204_v31 = vld [vmem:[%s6273_s6 + $0xf8] sm:$0xff]   ;;  %v4208_v39 = vld [vmem:[%s6273_s6 + $0xf0] sm:$0xff]   ;;  %v4212_v46 = vld [vmem:[%s6273_s6 + $0xe8] sm:$0xff]   ;;  %s3596_s28 = sld [smem:[#allocation6 + $0x1]] }
  0x2c   :  { %4118 = vmatpush3.msra.mxu1 %v272_v4  ;;  %4136 = vmatpush3.msk.msra.mxu0 %vm287_vm0, %v651_v9  ;;  %v4205_v32 = vld [vmem:[%s6273_s6 + $0x38] sm:$0xff]   ;;  %v4209_v42 = vld [vmem:[%s6273_s6 + $0x30] sm:$0xff]   ;;  %v4213_v48 = vld [vmem:[%s6273_s6 + $0x28] sm:$0xff]   ;;  %s3609_s22 = sld [smem:[#allocation3 + $0x2]] }
  0x2d   :  { %4120 = vmatmul.mubr.msk.f32.vlgmr.msra.gmra.mxu1 %vm274_vm1, %v83_v5  ;;  %4137 = vmatprep.subr.mxu0 %v650_v10  ;;  %v4206_v33 = vld [vmem:[%s6273_s6 + $0xb8] sm:$0xff]   ;;  %v4210_v43 = vld [vmem:[%s6273_s6 + $0xb0] sm:$0xff]   ;;  %v4214_v49 = vld [vmem:[%s6273_s6 + $0xa8] sm:$0xff]   ;;  %s3610_s23 = sld [smem:[#allocation6 + $0x2]] }
  0x2e   :  { %4122 = vmatprep.mubr.msk.f32.mxu1 %vm274_vm1, %v84_v8  ;;  %4138 = vmatpush3.msra.mxu0 %v650_v10  ;;  %v477_v29 = vstv %s476_s1  ;;  %v4215_v51 = vld [vmem:[%s6273_s6 + $0x60] sm:$0xff]   ;;  %v4219_v57 = vld [vmem:[%s6273_s6 + $0x58] sm:$0xff]   ;;  %v4223_v1 = vld [vmem:[%s6273_s6 + $0x50] sm:$0xff]   ;;  %s3416_s27 = sld [smem:[#allocation8]] }
  0x2f   :  { %4140 = vmatmul.mubr.msk.f32.vlgmr.msra.gmra.mxu0 %vm274_vm1, %v83_v5  ;;  %4155 = vmatprep.subr.msk.mxu0 %vm287_vm0, %v1009_v12  ;;  %v483_v35 = vstv %s482_s2  ;;  %v4216_v52 = vld [vmem:[%s6273_s6 + $0xe0] sm:$0xff]   ;;  %v4220_v58 = vld [vmem:[%s6273_s6 + $0xd8] sm:$0xff]   ;;  %v4225_v3 = vld [vmem:[%s6273_s6 + $0x10] sm:$0xff]   ;;  %s3804_s29 = sld [smem:[#allocation8 + $0x2]] }
  0x30   :  { %4142 = vmatprep.mubr.msk.f32.mxu0 %vm274_vm1, %v84_v8  ;;  %4156 = vmatpush3.msk.msra.mxu0 %vm287_vm0, %v1009_v12  ;;  %v4217_v55 = vld [vmem:[%s6273_s6 + $0x20] sm:$0xff]   ;;  %v4221_v61 = vld [vmem:[%s6273_s6 + $0x18] sm:$0xff]   ;;  %v838_v0 = vstv %s3595_s20  ;;  %v4226_v4 = vld [vmem:[%s6273_s6 + $0x90] sm:$0xff]  }
  0x31   :  { %4123 = vmatmul.mubr.msk.f32.gmra.mxu1 %vm274_vm1, %v85_v13  ;;  %4157 = vmatprep.subr.mxu0 %v1008_v14  ;;  %v4218_v56 = vld [vmem:[%s6273_s6 + $0xa0] sm:$0xff]   ;;  %v4222_v62 = vld [vmem:[%s6273_s6 + $0x98] sm:$0xff]   ;;  %v844_v6 = vstv %s3596_s28  ;;  %v4228_v9 = vld [vmem:[%s6273_s6 + $0xc8] sm:$0xff]  }
  0x32   :  { %4158 = vmatpush3.msra.mxu0 %v1008_v14  ;;  %4125 = vmatprep.subr.msk.mxu1 %vm287_vm0, %v87_v15  ;;  %v4229_v10 = vld [vmem:[%s6273_s6 + $0x8] sm:$0xff]  }
  0x33   :  { %4143 = vmatmul.mubr.msk.f32.gmra.mxu0 %vm274_vm1, %v85_v13  ;;  %4126 = vmatpush3.msk.msra.mxu1 %vm287_vm0, %v87_v15  ;;  %v4230_v11 = vld [vmem:[%s6273_s6 + $0x88] sm:$0xff]  }
  0x34   :  { %4159 = vmatprep.mubr.msk.f32.mxu0 %vm274_vm1, %v82_v2  ;;  %4127 = vmatprep.subr.mxu1 %v86_v16  ;;  %v4224_v2 = vld [vmem:[%s6273_s6 + $0xd0] sm:$0xff]  }
  0x35   :  { %4128 = vmatpush3.msra.mxu1 %v86_v16  ;;  %3842 = vmatprep.subr.bf16.mxu0 %v4203_v30  ;;  %v1202_v30 = vstv %s3610_s23 }
  0x36   :  { %4145 = vmatprep.subr.msk.mxu1 %vm287_vm0, %v87_v15 }
  0x37   :  { %4160 = vmatmul.mubr.msk.f32.vlgmr.msra.gmra.mxu0 %vm274_vm1, %v83_v5 }
  0x38   :  { %4162 = vmatprep.mubr.msk.f32.mxu0 %vm274_vm1, %v84_v8  ;;  %3843 = vmatpush3.bf16.msra.mxu0 %v4205_v32  ;;  %v4227_v8 = vld [vmem:[%s6273_s6 + $0x48] sm:$0xff]  }
  0x39   :  { %3844 = vmatprep.subr.bf16.mxu0 %v4207_v38 }
  0x3b   :  { %4163 = vmatmul.mubr.msk.f32.gmra.mxu0 %vm274_vm1, %v85_v13 }
  0x3c   :  { %3845 = vmatpush3.bf16.msra.mxu0 %v4209_v42  ;;  %v88_v42 = vlaneseq }
  0x3d   :  { %3846 = vmatprep.subr.bf16.mxu0 %v4211_v45 }
  0x3e   :  { %v4817_v45 = vand.u32 127, %v88_v42 }
  0x40   :  { %3847 = vmatpush3.bf16.msra.mxu0 %v4213_v48 }
  0x41   :  { %3848 = vmatprep.subr.bf16.mxu0 %v4215_v51  ;;  %v4829_v51 = vadd.s32 512, %v4817_v45 }
  0x44   :  { %3849 = vmatpush3.bf16.msra.mxu0 %v4217_v55 }
  0x45   :  { %3850 = vmatprep.subr.bf16.mxu0 %v4219_v57 }
  0x48   :  { %3851 = vmatpush3.bf16.msra.mxu0 %v4221_v61 }
  0x49   :  { %3852 = vmatprep.subr.bf16.mxu0 %v4223_v1  ;;  %v6415_v1 = vmov 0 }
  0x4c   :  { %3853 = vmatpush3.bf16.msra.mxu0 %v4225_v3 }
  0x4d   :  { %3854 = vmatprep.subr.bf16.mxu0 %v4227_v8  ;;  %v6336_v8 = vmov 0 }
  0x50   :  { %3855 = vmatpush3.bf16.msra.mxu0 %v4229_v10  ;;  %v6340_v10 = vmov 0 }
  0xed   :  { %v4121_v17 = vpop.f32.mrf.mxu1 }
  0xef   :  { %v357_v18 = vpop.f32.mrf.mxu1  ;;  %v4141_v19 = vpop.f32.mrf.mxu0 }
  0xf0   :  { %4129 = vmatprep.mubr.msk.f32.mxu1 %vm274_vm1, %v357_v18  ;;  %v4234_v18 = vld [vmem:[%s6273_s6 + $0x80] sm:$0xff]  }
  0xf1   :  { %4130 = vmatmul.mubr.msk.f32.vlgmr.msra.gmra.mxu1 %vm274_vm1, %v4121_v17  ;;  %v4124_v20 = vpop.f32.mrf.mxu1  ;;  %v721_v21 = vpop.f32.mrf.mxu0  ;;  %v4233_v17 = vld [vmem:[%s6273_s6] sm:$0xff]  }
  0xf2   :  { %4146 = vmatpush3.msk.msra.mxu1 %vm287_vm0, %v87_v15 }
  0xf3   :  { %v367_v22 = vpop.f32.mrf.mxu1  ;;  %4147 = vmatprep.subr.mxu1 %v86_v16  ;;  %v4144_v23 = vpop.f32.mrf.mxu0 }
  0xf4   :  { %4132 = vmatprep.mubr.msk.f32.mxu1 %vm274_vm1, %v367_v22  ;;  %4148 = vmatpush3.msra.mxu1 %v86_v16  ;;  %v4236_v22 = vld [vmem:[%s6273_s6 + $0x1f8] sm:$0xff]  }
  0xf5   :  { %4133 = vmatmul.mubr.msk.f32.gmra.mxu1 %vm274_vm1, %v4124_v20  ;;  %v731_v24 = vpop.f32.mrf.mxu0  ;;  %4165 = vmatprep.subr.msk.mxu1 %vm287_vm0, %v87_v15 }
  0xf6   :  { %4149 = vmatprep.mubr.msk.f32.mxu1 %vm274_vm1, %v721_v21  ;;  %v4235_v21 = vld [vmem:[%s6273_s6 + $0x178] sm:$0xff]  }
  0xf7   :  { %v4161_v25 = vpop.f32.mrf.mxu0 }
  0xf9   :  { %4150 = vmatmul.mubr.msk.f32.vlgmr.msra.gmra.mxu1 %vm274_vm1, %v4141_v19  ;;  %v1079_v26 = vpop.f32.mrf.mxu0 }
  0xfa   :  { %4152 = vmatprep.mubr.msk.f32.mxu1 %vm274_vm1, %v731_v24  ;;  %4166 = vmatpush3.msk.msra.mxu1 %vm287_vm0, %v87_v15  ;;  %v4231_v15 = vld [vmem:[%s6273_s6 + $0x40] sm:$0xff]  }
  0xfb   :  { %4167 = vmatprep.subr.mxu1 %v86_v16  ;;  %v4164_v27 = vpop.f32.mrf.mxu0  ;;  %3856 = vmatprep.subr.bf16.mxu0 %v4231_v15  ;;  %v6355_v15 = vmov 0 }
  0xfc   :  { %4168 = vmatpush3.msra.mxu1 %v86_v16  ;;  %v4232_v16 = vld [vmem:[%s6273_s6 + $0xc0] sm:$0xff]   ;;  %3857 = vmatpush3.bf16.msra.mxu0 %v4233_v17 }
  0xfd   :  { %4153 = vmatmul.mubr.msk.f32.gmra.mxu1 %vm274_vm1, %v4144_v23  ;;  %v1089_v28 = vpop.f32.mrf.mxu0  ;;  %3864 = vmatprep.subr.bf16.mxu1 %v4204_v31 }
  0xfe   :  { %4169 = vmatprep.mubr.msk.f32.mxu1 %vm274_vm1, %v1079_v26  ;;  %3886 = vmatprep.subr.bf16.mxu0 %v4235_v21  ;;  %v6372_v21 = vmov 0 }
 0x101   :  { %4170 = vmatmul.mubr.msk.f32.vlgmr.msra.gmra.mxu1 %vm274_vm1, %v4161_v25 }
 0x102   :  { %4172 = vmatprep.mubr.msk.f32.mxu1 %vm274_vm1, %v1089_v28  ;;  %3865 = vmatpush3.bf16.msra.mxu1 %v4206_v33  ;;  %v1196_v28 = vstv %s3609_s22 }
 0x103   :  { %3866 = vmatprep.subr.bf16.mxu1 %v4208_v39 }
 0x105   :  { %4173 = vmatmul.mubr.msk.f32.gmra.mxu1 %vm274_vm1, %v4164_v27 }
 0x106   :  { %3867 = vmatpush3.bf16.msra.mxu1 %v4210_v43  ;;  %v4814_v43 = vshrl.u32 %v88_v42, 7 }
 0x107   :  { %3868 = vmatprep.subr.bf16.mxu1 %v4212_v46 }
 0x108   :  { %6320 = vst [vmem:[#allocation17_spill] sm:$0xff] %v4814_v43  ;;  %v100_v48 = vadd.s32 16, %v4814_v43 }
 0x10a   :  { %3869 = vmatpush3.bf16.msra.mxu1 %v4214_v49  ;;  %v4823_v49 = vmul.u32 32, %v4814_v43  ;;  %v4838_v55 = vmul.u32 32, %v100_v48 }
 0x10b   :  { %3870 = vmatprep.subr.bf16.mxu1 %v4216_v52  ;;  %v4832_v52 = vadd.s32 768, %v4817_v45 }
 0x10c   :  { %v4844_v57 = vadd.s32 32, %v4823_v49  ;;  %vm106_vm12 = vcmp.ge.s32.totalorder %v4817_v45, %v4823_v49 }
 0x10e   :  { %3871 = vmatpush3.bf16.msra.mxu1 %v4218_v56  ;;  %v4841_v56 = vadd.s32 128, %v4817_v45  ;;  %vm142_vm13 = vcmp.lt.s32.totalorder %v4817_v45, %v4844_v57 }
 0x10f   :  { %3872 = vmatprep.subr.bf16.mxu1 %v4220_v58  ;;  %v4847_v58 = vadd.s32 384, %v4817_v45 }
 0x110   :  { %vm107_vm10 = vcmp.ge.s32.totalorder %v4841_v56, %v4823_v49 }
 0x112   :  { %3873 = vmatpush3.bf16.msra.mxu1 %v4222_v62  ;;  %v4868_v62 = vadd.s32 32, %v4838_v55 }
 0x113   :  { %3874 = vmatprep.subr.bf16.mxu1 %v4224_v2 }
 0x116   :  { %3875 = vmatpush3.bf16.msra.mxu1 %v4226_v4 }
 0x117   :  { %3876 = vmatprep.subr.bf16.mxu1 %v4228_v9  ;;  %v4987_v9 = vadd.s32 896, %v4817_v45 }
 0x11a   :  { %3877 = vmatpush3.bf16.msra.mxu1 %v4230_v11  ;;  %v6344_v11 = vmov 0 }
 0x11b   :  { %3878 = vmatprep.subr.bf16.mxu1 %v4232_v16  ;;  %v6359_v16 = vmov 0 }
 0x11e   :  { %3879 = vmatpush3.bf16.msra.mxu1 %v4234_v18 }
 0x11f   :  { %3908 = vmatprep.subr.bf16.mxu1 %v4236_v22 }
 0x1b1   :  { %v4131_v34 = vpop.f32.mrf.mxu1 }
 0x1b2   :  { %v479_v36 = vmul.f32 %v4131_v34, %v477_v29 }
 0x1b3   :  { %v457_v37 = vpop.f32.mrf.mxu1 }
 0x1b4   :  { %v4634_v40 = vadd.f32 %v483_v35, %v479_v36  ;;  %v478_v41 = vmul.f32 %v477_v29, %v457_v37 }
 0x1b5   :  { %v4134_v44 = vpop.f32.mrf.mxu1 }
 0x1b6   :  { %506 = vrot.lane.b32.xlu1 %v4634_v40, %s4462_s12  ;;  %494 = vrot.lane.b32.xlu0 %v4634_v40, %s4463_s4  ;;  %v4652_v47 = vadd.f32 %v483_v35, %v478_v41  ;;  %v481_v53 = vmul.f32 %v4134_v44, %v477_v29  ;;  %v99_v44 = vadd.s32 8, %v4814_v43 }
 0x1b7   :  { %v467_v50 = vpop.f32.mrf.mxu1 }
 0x1b8   :  { %v480_v54 = vmul.f32 %v477_v29, %v467_v50  ;;  %v4686_v59 = vadd.f32 %v483_v35, %v481_v53  ;;  %v4819_v46 = vmul.u32 32, %v99_v44  ;;  %v4826_v50 = vadd.s32 256, %v4817_v45 }
 0x1b9   :  { %v4151_v63 = vpop.f32.mrf.mxu1  ;;  %v6398_v44 = vmov 0 }
 0x1ba   :  { %518 = vrot.lane.b32.xlu0 %v4634_v40, %s4464_s19  ;;  %504 = vrot.lane.b32.xlu1 %v4652_v47, %s4462_s12  ;;  %v4688_v60 = vadd.f32 %v483_v35, %v480_v54  ;;  %v840_v5 = vmul.f32 %v4151_v63, %v838_v0  ;;  %v4835_v53 = vadd.s32 32, %v4819_v46  ;;  %v101_v54 = vadd.s32 24, %v4814_v43 }
 0x1bb   :  { %v818_v7 = vpop.f32.mrf.mxu1  ;;  %vm114_vm2 = vcmp.ge.s32.totalorder %v4817_v45, %v4819_v46  ;;  %vm116_vm3 = vcmp.ge.s32.totalorder %v4826_v50, %v4819_v46  ;;  %vm118_vm4 = vcmp.ge.s32.totalorder %v4829_v51, %v4819_v46  ;;  %vm120_vm5 = vcmp.ge.s32.totalorder %v4832_v52, %v4819_v46 }
 0x1bc   :  { %v4728_v12 = vadd.f32 %v844_v6, %v840_v5  ;;  %v839_v13 = vmul.f32 %v838_v0, %v818_v7  ;;  %vm150_vm6 = vcmp.lt.s32.totalorder %v4817_v45, %v4835_v53  ;;  %vm152_vm7 = vcmp.lt.s32.totalorder %v4826_v50, %v4835_v53 }
 0x1bd   :  { %v4154_v14 = vpop.f32.mrf.mxu1  ;;  %vm154_vm8 = vcmp.lt.s32.totalorder %v4829_v51, %v4835_v53  ;;  %v4863_v61 = vmul.u32 32, %v101_v54  ;;  %vm156_vm9 = vcmp.lt.s32.totalorder %v4832_v52, %v4835_v53  ;;  %vm151_vm11 = vcmp.lt.s32.totalorder %v4841_v56, %v4835_v53  ;;  %vm4886_vm15 = vmand %vm114_vm2, %vm150_vm6 }
 0x1be   :  { %516 = vrot.lane.b32.xlu1 %v4652_v47, %s4464_s19  ;;  %492 = vrot.lane.b32.xlu0 %v4652_v47, %s4463_s4  ;;  %v4746_v19 = vadd.f32 %v844_v6, %v839_v13  ;;  %v842_v23 = vmul.f32 %v4154_v14, %v838_v0  ;;  %v4881_v63 = vadd.s32 640, %v4817_v45  ;;  %vm4893_vm0 = vmand %vm116_vm3, %vm152_vm7  ;;  %vm108_vm1 = vcmp.ge.s32.totalorder %v4826_v50, %v4823_v49 }
 0x1bf   :  { %v828_v20 = vpop.f32.mrf.mxu1  ;;  %vm144_vm14 = vcmp.lt.s32.totalorder %v4826_v50, %v4844_v57  ;;  %vm143_vm2 = vcmp.lt.s32.totalorder %v4841_v56, %v4844_v57  ;;  %vm4911_vm3 = vmand %vm118_vm4, %vm154_vm8  ;;  %v4926_v4 = vadd.s32 32, %v4863_v61  ;;  %vm158_vm7 = vcmp.lt.s32.totalorder %v4817_v45, %v4868_v62 }
 0x1c0   :  { %v841_v24 = vmul.f32 %v838_v0, %v828_v20  ;;  %v4762_v25 = vadd.f32 %v844_v6, %v842_v23  ;;  %vm4921_vm6 = vmand %vm120_vm5, %vm156_vm9  ;;  %vm6331_vm8 = vcmp.ge.s32.totalorder %v4841_v56, %v4819_v46  ;;  %v6334_v7 = vmov 0 }
 0x1c1   :  { %v4171_v27 = vpop.f32.mrf.mxu1  ;;  %vm4940_vm5 = vmand %vm106_vm12, %vm142_vm13  ;;  %v6347_v13 = vmov 0  ;;  %v6351_v14 = vmov 0  ;;  %v6369_v20 = vmov 0 }
 0x1c2   :  { %498 = vrot.lane.b32.xlu0 %v4686_v59, %s4463_s4  ;;  %508 = vrot.lane.b32.xlu1 %v4688_v60, %s4462_s12  ;;  %v4764_v26 = vadd.f32 %v844_v6, %v841_v24  ;;  %v1198_v29 = vmul.f32 %v4171_v27, %v1196_v28  ;;  %vm4954_vm4 = vmand %vm6331_vm8, %vm151_vm11  ;;  %v6332_v6 = vmov 0  ;;  %vm6346_vm8 = vcmp.ge.s32.totalorder %v4817_v45, %v4838_v55 }
 0x1c3   :  { %v1176_v31 = vpop.f32.mrf.mxu1  ;;  %v6333_v6 = vsel %vm4954_vm4, 4294967295, %v6332_v6  ;;  %vm4968_vm9 = vmand %vm108_vm1, %vm144_vm14  ;;  %vm6342_vm14 = vcmp.lt.s32.totalorder %v4847_v58, %v4835_v53  ;;  %vm6343_vm1 = vcmp.ge.s32.totalorder %v4847_v58, %v4819_v46 }
 0x1c4   :  { %v4778_v32 = vadd.f32 %v1202_v30, %v1198_v29  ;;  %v1197_v33 = vmul.f32 %v1196_v28, %v1176_v31  ;;  %v6335_v7 = vsel %vm4968_vm9, 4294967295, %v6334_v7  ;;  %vm4982_vm12 = vmand %vm107_vm10, %vm143_vm2  ;;  %vm6338_vm10 = vcmp.lt.s32.totalorder %v4847_v58, %v4844_v57 }
 0x1c5   :  { %v4174_v34 = vpop.f32.mrf.mxu1  ;;  %v6337_v8 = vsel %vm4982_vm12, 4294967295, %v6336_v8  ;;  %vm6339_vm2 = vcmp.ge.s32.totalorder %v4847_v58, %v4823_v49  ;;  %vm5013_vm11 = vmand %vm6343_vm1, %vm6342_vm14  ;;  %vm166_vm14 = vcmp.lt.s32.totalorder %v4817_v45, %v4926_v4  ;;  %vm168_vm1 = vcmp.lt.s32.totalorder %v4826_v50, %v4926_v4 }
 0x1c6   :  { %520 = vrot.lane.b32.xlu1 %v4688_v60, %s4464_s19  ;;  %496 = vrot.lane.b32.xlu0 %v4688_v60, %s4463_s4  ;;  %6316 = vst [vmem:[#allocation13_spill] sm:$0xff] %v4778_v32  ;;  %v4784_v35 = vadd.f32 %v1202_v30, %v1197_v33  ;;  %v1200_v37 = vmul.f32 %v4174_v34, %v1196_v28  ;;  %vm5003_vm13 = vmand %vm6339_vm2, %vm6338_vm10  ;;  %v6345_v11 = vsel %vm5013_vm11, 4294967295, %v6344_v11  ;;  %v6281_v29 = vmov 0.0  }
 0x1c7   :  { %v1186_v36 = vpop.f32.mrf.mxu1  ;;  %v6341_v10 = vsel %vm5003_vm13, 4294967295, %v6340_v10  ;;  %vm5023_vm10 = vmand %vm6346_vm8, %vm158_vm7  ;;  %vm6349_vm11 = vcmp.lt.s32.totalorder %v4881_v63, %v4844_v57  ;;  %vm6350_vm7 = vcmp.ge.s32.totalorder %v4881_v63, %v4823_v49  ;;  %vm6353_vm2 = vcmp.lt.s32.totalorder %v4826_v50, %v4868_v62 }
 0x1c8   :  { %6317 = vst [vmem:[#allocation14_spill] sm:$0xff] %v4784_v35  ;;  %v1199_v38 = vmul.f32 %v1196_v28, %v1186_v36  ;;  %v4794_v39 = vadd.f32 %v1202_v30, %v1200_v37  ;;  %v6348_v13 = vsel %vm5023_vm10, 4294967295, %v6347_v13  ;;  %vm5041_vm8 = vmand %vm6350_vm7, %vm6349_vm11  ;;  %vm6354_vm13 = vcmp.ge.s32.totalorder %v4826_v50, %v4838_v55 }
 0x1c9   :  { %v6352_v14 = vsel %vm5041_vm8, 4294967295, %v6351_v14  ;;  %vm5051_vm10 = vmand %vm6354_vm13, %vm6353_vm2  ;;  %vm167_vm9 = vcmp.lt.s32.totalorder %v4841_v56, %v4926_v4  ;;  %vm6357_vm8 = vcmp.lt.s32.totalorder %v4841_v56, %v4868_v62  ;;  %vm6358_vm13 = vcmp.ge.s32.totalorder %v4841_v56, %v4838_v55 }
 0x1ca   :  { %522 = vrot.lane.b32.xlu1 %v4686_v59, %s4464_s19  ;;  %510 = vrot.lane.b32.xlu0 %v4686_v59, %s4462_s12  ;;  %6318 = vst [vmem:[#allocation15_spill] sm:$0xff] %v4794_v39  ;;  %v4796_v41 = vadd.f32 %v1202_v30, %v1199_v38  ;;  %v6356_v15 = vsel %vm5051_vm10, 4294967295, %v6355_v15  ;;  %vm5069_vm2 = vmand %vm6358_vm13, %vm6357_vm8  ;;  %vm6361_vm11 = vcmp.lt.s32.totalorder %v4847_v58, %v4868_v62  ;;  %v5157_v30 = vsel %vm4886_vm15, 1.0, %v6281_v29 }
 0x1cb   :  { %v6360_v16 = vsel %vm5069_vm2, 4294967295, %v6359_v16  ;;  %vm6362_vm7 = vcmp.ge.s32.totalorder %v4847_v58, %v4838_v55  ;;  %vm6365_vm12 = vcmp.ge.s32.totalorder %v4817_v45, %v4863_v61  ;;  %vm6368_vm2 = vcmp.ge.s32.totalorder %v4826_v50, %v4863_v61 }
 0x1cc   :  { %6319 = vst [vmem:[#allocation16_spill] sm:$0xff] %v4796_v41  ;;  %vm5083_vm4 = vmand %vm6362_vm7, %vm6361_vm11  ;;  %vm6374_vm7 = vcmp.lt.s32.totalorder %v4881_v63, %v4835_v53  ;;  %vm6375_vm8 = vcmp.ge.s32.totalorder %v4881_v63, %v4819_v46  ;;  %v5162_v31 = vsel %vm4893_vm0, 1.0, %v6281_v29  ;;  %vm165_vm15 = vcmp.lt.s32.totalorder %v4987_v9, %v4868_v62 }
 0x1cd   :  { %vm5094_vm10 = vmand %vm6365_vm12, %vm166_vm14  ;;  %vm6371_vm12 = vcmp.ge.s32.totalorder %v4841_v56, %v4863_v61  ;;  %v5181_v34 = vsel %vm4911_vm3, 1.0, %v6281_v29  ;;  %v5186_v36 = vsel %vm4921_vm6, 1.0, %v6281_v29  ;;  %vm6392_vm0 = vcmp.lt.s32.totalorder %v4881_v63, %v4926_v4 }
 0x1ce   :  { %855 = vrot.lane.b32.xlu1 %v4728_v12, %s4463_s4  ;;  %879 = vrot.lane.b32.xlu0 %v4728_v12, %s4464_s19  ;;  %vm5101_vm11 = vmand %vm6368_vm2, %vm168_vm1  ;;  %vm6379_vm1 = vcmp.ge.s32.totalorder %v4847_v58, %v4863_v61  ;;  %6390 = vst [vmem:[#allocation18_spill] sm:$0xff] %v5181_v34  ;;  %v5205_v38 = vsel %vm4940_vm5, 1.0, %v6281_v29  ;;  %vm6396_vm6 = vnez %v6333_v6  ;;  %vm6401_vm3 = vnez %v6337_v8 }
 0x1cf   :  { %v6370_v20 = vsel %vm5101_vm11, 4294967295, %v6369_v20  ;;  %vm5112_vm14 = vmand %vm6371_vm12, %vm167_vm9  ;;  %vm6383_vm12 = vcmp.ge.s32.totalorder %v4987_v9, %v4823_v49  ;;  %6391 = vst [vmem:[#allocation19_spill] sm:$0xff] %v5186_v36  ;;  %v5210_v42 = vsel %vm6396_vm6, 1.0, %v6281_v29  ;;  %vm6400_vm6 = vnez %v6335_v7 }
 0x1d0   :  { %v6373_v21 = vsel %vm5112_vm14, 4294967295, %v6372_v21  ;;  %vm5126_vm13 = vmand %vm6375_vm8, %vm6374_vm7  ;;  %vm6378_vm14 = vcmp.lt.s32.totalorder %v4847_v58, %v4926_v4  ;;  %vm157_vm8 = vcmp.lt.s32.totalorder %v4987_v9, %v4835_v53  ;;  %vm6382_vm7 = vcmp.lt.s32.totalorder %v4987_v9, %v4844_v57 }
 0x1d1   :  { %vm5136_vm11 = vmand %vm6379_vm1, %vm6378_vm14  ;;  %vm6386_vm14 = vcmp.lt.s32.totalorder %v4881_v63, %v4868_v62  ;;  %vm6387_vm1 = vcmp.ge.s32.totalorder %v4881_v63, %v4838_v55  ;;  %v5229_v45 = vsel %vm6400_vm6, 1.0, %v6281_v29  ;;  %v5234_v48 = vsel %vm6401_vm3, 1.0, %v6281_v29 }
 0x1d2   :  { %867 = vrot.lane.b32.xlu1 %v4728_v12, %s4462_s12  ;;  %853 = vrot.lane.b32.xlu0 %v4746_v19, %s4463_s4  ;;  %vm5150_vm9 = vmand %vm6383_vm12, %vm6382_vm7  ;;  %vm129_vm7 = vcmp.ge.s32.totalorder %v4987_v9, %v4838_v55  ;;  %vm6404_vm6 = vnez %v6341_v10  ;;  %vm6405_vm3 = vnez %v6345_v11  ;;  %v6408_v58 = vmov 0 }
 0x1d3   :  { %vm5170_vm12 = vmand %vm6387_vm1, %vm6386_vm14  ;;  %vm6393_vm14 = vcmp.ge.s32.totalorder %v4881_v63, %v4863_v61  ;;  %v5247_v54 = vsel %vm6404_vm6, 1.0, %v6281_v29  ;;  %v5252_v56 = vsel %vm6405_vm3, 1.0, %v6281_v29  ;;  %vm126_vm2 = vcmp.ge.s32.totalorder %v4829_v51, %v4838_v55 }
 0x1d4   :  { %vm5194_vm1 = vmand %vm6393_vm14, %vm6392_vm0  ;;  %vm6397_vm0 = vcmp.ge.s32.totalorder %v4987_v9, %v4819_v46  ;;  %v6402_v46 = vmov 0  ;;  %vm162_vm6 = vcmp.lt.s32.totalorder %v4829_v51, %v4868_v62  ;;  %vm6410_vm3 = vnez %v6348_v13 }
 0x1d5   :  { %vm5218_vm14 = vmand %vm6397_vm0, %vm157_vm8  ;;  %v5271_v63 = vsel %vm6410_vm3, 1.0, %v6281_v29  ;;  %vm6411_vm5 = vnez %v6352_v14  ;;  %vm164_vm3 = vcmp.lt.s32.totalorder %v4832_v52, %v4868_v62  ;;  %v5334_v8 = vsel %vm5094_vm10, 1.0, %v6281_v29 }
 0x1d6   :  { %877 = vrot.lane.b32.xlu1 %v4746_v19, %s4464_s19  ;;  %865 = vrot.lane.b32.xlu0 %v4746_v19, %s4462_s12  ;;  %v6399_v44 = vsel %vm5218_vm14, 4294967295, %v6398_v44  ;;  %vm5236_vm8 = vmand %vm129_vm7, %vm165_vm15  ;;  %vm6406_vm7 = vcmp.lt.s32.totalorder %v4987_v9, %v4926_v4  ;;  %vm6407_vm15 = vcmp.ge.s32.totalorder %v4987_v9, %v4863_v61  ;;  %v5276_v0 = vsel %vm6411_vm5, 1.0, %v6281_v29 }
 0x1d7   :  { %v6403_v46 = vsel %vm5236_vm8, 4294967295, %v6402_v46  ;;  %vm5260_vm0 = vmand %vm6407_vm15, %vm6406_vm7  ;;  %6412 = vst [vmem:[#allocation20_spill] sm:$0xff] %v5276_v0  ;;  %vm6413_vm7 = vcmp.lt.s32.totalorder %v4829_v51, %v4844_v57  ;;  %vm6414_vm15 = vcmp.ge.s32.totalorder %v4829_v51, %v4823_v49  ;;  %vm6417_vm14 = vcmask 261120  }
 0x1d8   :  { %v6409_v58 = vsel %vm5260_vm0, 4294967295, %v6408_v58  ;;  %vm5284_vm0 = vmand %vm6414_vm15, %vm6413_vm7  ;;  %vm6418_vm5 = vnez %v6356_v15  ;;  %vm6419_vm7 = vcmp.lt.s32.totalorder %v4832_v52, %v4844_v57  ;;  %vm6420_vm15 = vcmp.ge.s32.totalorder %v4832_v52, %v4823_v49 }
 0x1d9   :  { %v6416_v1 = vsel %vm5284_vm0, 4294967295, %v6415_v1  ;;  %v5297_v3 = vsel %vm6418_vm5, 1.0, %v6281_v29  ;;  %vm5305_vm0 = vmand %vm6420_vm15, %vm6419_vm7  ;;  %vm6423_vm5 = vnez %v6360_v16  ;;  %v5321_v57 = vsel %vm5083_vm4, 1.0, %v6281_v29 }
 0x1da   :  { %869 = vrot.lane.b32.xlu1 %v4764_v26, %s4462_s12  ;;  %859 = vrot.lane.b32.xlu0 %v4762_v25, %s4463_s4  ;;  %vm5323_vm7 = vmand %vm126_vm2, %vm162_vm6  ;;  %vm136_vm15 = vcmp.ge.s32.totalorder %v4832_v52, %v4863_v61  ;;  %vm172_vm8 = vcmp.lt.s32.totalorder %v4832_v52, %v4926_v4  ;;  %vm6426_vm4 = vnez %v6370_v20  ;;  %vm6427_vm2 = vnez %v6373_v21 }
 0x1db   :  { %v5339_v9 = vsel %vm6426_vm4, 1.0, %v6281_v29  ;;  %v5344_v10 = vsel %vm6427_vm2, 1.0, %v6281_v29  ;;  %v5349_v11 = vsel %vm5136_vm11, 1.0, %v6281_v29  ;;  %vm6428_vm10 = vcmp.ge.s32.totalorder %v4832_v52, %v4838_v55 }
 0x1dc   :  { %vm5357_vm6 = vmand %vm6428_vm10, %vm164_vm3  ;;  %vm6432_vm4 = vcmask 261120   ;;  %v5367_v16 = vsel %vm5126_vm13, 1.0, %v6281_v29  ;;  %v5372_v62 = vsel %vm5170_vm12, 1.0, %v6281_v29  ;;  %vm6435_vm11 = vcmp.ge.s32.totalorder %v4829_v51, %v4863_v61 }
 0x1dd   :  { %6433 = vst [vmem:[#allocation21_spill] sm:$0xff] %v5367_v16  ;;  %6434 = vst [vmem:[#allocation22_spill] sm:$0xff] %v5372_v62  ;;  %vm6438_vm2 = vcmask 785408   ;;  %v5389_v18 = vsel %vm5194_vm1, 1.0, %v6281_v29  ;;  %v5394_v20 = vsel %vm5150_vm9, 1.0, %v6281_v29  ;;  %vm6445_vm1 = vnez %v6403_v46 }
 0x1de   :  { %881 = vrot.lane.b32.xlu1 %v4764_v26, %s4464_s19  ;;  %857 = vrot.lane.b32.xlu0 %v4764_v26, %s4463_s4  ;;  %6440 = vst [vmem:[#allocation23_spill] sm:$0xff] %v5389_v18  ;;  %6441 = vst [vmem:[#allocation24_spill] sm:$0xff] %v5394_v20  ;;  %v5411_v22 = vsel %vm6445_vm1, 1.0, %v6281_v29  ;;  %vm6447_vm9 = vnez %v6409_v58  ;;  %v5426_v24 = vsel %vm5305_vm0, 1.0, %v6281_v29 }
 0x1df   :  { %vm204_vm13 = vmand %vm136_vm15, %vm172_vm8  ;;  %6446 = vst [vmem:[#allocation26_spill] sm:$0xff] %v5411_v22  ;;  %vm6448_vm8 = vnez %v6416_v1 }
 0x1e0   :  { %vm6442_vm12 = vmmov %vm6438_vm2  ;;  %v5421_v61 = vsel %vm6448_vm8, 1.0, %v6281_v29  ;;  %6450 = vst [vmem:[#allocation28_spill] sm:$0xff] %v5426_v24  ;;  %v5446_v46 = vsel %vm204_vm13, 1.0, %v6281_v29 }
 0x1e1   :  { %6449 = vst [vmem:[#allocation27_spill] sm:$0xff] %v5421_v61  ;;  %6453 = vst [vmem:[#allocation31_spill] sm:$0xff] %v5446_v46 }
 0x1e2   :  { %883 = vrot.lane.b32.xlu1 %v4762_v25, %s4464_s19  ;;  %871 = vrot.lane.b32.xlu0 %v4762_v25, %s4462_s12  ;;  %vm6454_vm0 = vmmov %vm6432_vm4 }
 0x1e3   :  { %vm6466_vm1 = vmmov %vm6454_vm0 }
 0x1e6   :  { %1213 = vrot.lane.b32.xlu1 %v4778_v32, %s4463_s4  ;;  %1237 = vrot.lane.b32.xlu0 %v4778_v32, %s4464_s19 }
 0x1ea   :  { %1225 = vrot.lane.b32.xlu1 %v4778_v32, %s4462_s12  ;;  %1211 = vrot.lane.b32.xlu0 %v4784_v35, %s4463_s4 }
 0x1ee   :  { %1223 = vrot.lane.b32.xlu0 %v4784_v35, %s4462_s12  ;;  %1235 = vrot.lane.b32.xlu1 %v4784_v35, %s4464_s19 }
 0x1f2   :  { %1217 = vrot.lane.b32.xlu0 %v4794_v39, %s4463_s4  ;;  %1227 = vrot.lane.b32.xlu1 %v4796_v41, %s4462_s12 }
 0x1f6   :  { %1215 = vrot.lane.b32.xlu0 %v4796_v41, %s4463_s4  ;;  %1239 = vrot.lane.b32.xlu1 %v4796_v41, %s4464_s19 }
 0x1fa   :  { %1229 = vrot.lane.b32.xlu0 %v4794_v39, %s4462_s12  ;;  %1241 = vrot.lane.b32.xlu1 %v4794_v39, %s4464_s19 }
 0x228   :  { %v507_v27 = vpop.permute.xlu1 %506  ;;  %v495_v28 = vpop.permute.xlu0 %494 }
 0x229   :  { %v530_v2 = vsel %vm6417_vm14, %v4634_v40, %v495_v28  ;;  %vm170_vm14 = vcmp.lt.s32.totalorder %v4829_v51, %v4926_v4  ;;  %v5316_v40 = vsel %vm6423_vm5, 1.0, %v6281_v29  ;;  %vm6431_vm5 = vcmask 523264  }
 0x22a   :  { %v535_v14 = vsel %vm6431_vm5, %v530_v2, %v507_v27  ;;  %vm5380_vm3 = vmand %vm6435_vm11, %vm170_vm14  ;;  %vm6443_vm14 = vnez %v6399_v44  ;;  %v5416_v4 = vsel %vm6447_vm9, 1.0, %v6281_v29  ;;  %v5431_v27 = vsel %vm5323_vm7, 1.0, %v6281_v29 }
 0x22b   :  { %vm6439_vm10 = vmmov %vm6431_vm5  ;;  %v5406_v21 = vsel %vm6443_vm14, 1.0, %v6281_v29  ;;  %6451 = vst [vmem:[#allocation29_spill] sm:$0xff] %v5431_v27  ;;  %v5436_v28 = vsel %vm5357_vm6, 1.0, %v6281_v29  ;;  %v5443_v44 = vsel %vm5380_vm3, 1.0, %v6281_v29 }
 0x22c   :  { %v519_v50 = vpop.permute.xlu0 %518  ;;  %v505_v53 = vpop.permute.xlu1 %504  ;;  %6444 = vst [vmem:[#allocation25_spill] sm:$0xff] %v5406_v21  ;;  %6452 = vst [vmem:[#allocation30_spill] sm:$0xff] %v5443_v44 }
 0x22d   :  { %vm6455_vm7 = vmmov %vm6454_vm0 }
 0x22e   :  { %vm6456_vm15 = vmmov %vm6431_vm5 }
 0x22f   :  { %vm6457_vm6 = vmmov %vm6438_vm2 }
 0x230   :  { %v517_v6 = vpop.permute.xlu1 %516  ;;  %v493_v7 = vpop.permute.xlu0 %492  ;;  %vm6459_vm11 = vmmov %vm6454_vm0 }
 0x231   :  { %v529_v15 = vsel %vm6432_vm4, %v4652_v47, %v493_v7  ;;  %v540_v47 = vsel %vm6438_vm2, %v535_v14, %v519_v50  ;;  %vm6458_vm4 = vmmov %vm6438_vm2 }
 0x232   :  { %v534_v17 = vsel %vm6439_vm10, %v529_v15, %v505_v53  ;;  %v551_v33 = vmul.f32 %v5157_v30, %v540_v47  ;;  %v553_v50 = vmul.f32 %v5162_v31, %v540_v47  ;;  %v555_v2 = vmul.f32 %v5181_v34, %v540_v47  ;;  %vm6460_vm3 = vmmov %vm6431_vm5 }
 0x233   :  { %v539_v51 = vsel %vm6442_vm12, %v534_v17, %v517_v6  ;;  %v552_v5 = vmul.f32 %v5210_v42, %v540_v47  ;;  %v557_v7 = vmul.f32 %v5186_v36, %v540_v47  ;;  %v554_v15 = vmul.f32 %v5252_v56, %v540_v47  ;;  %vm6461_vm2 = vmmov %vm6454_vm0 }
 0x234   :  { %v499_v23 = vpop.permute.xlu0 %498  ;;  %v509_v52 = vpop.permute.xlu1 %508  ;;  %v544_v37 = vmul.f32 %v5234_v48, %v539_v51  ;;  %v543_v53 = vmul.f32 %v5205_v38, %v539_v51  ;;  %v545_v58 = vmul.f32 %v5229_v45, %v539_v51  ;;  %v546_v1 = vmul.f32 %v5247_v54, %v539_v51  ;;  %vm6462_vm10 = vmmov %vm6460_vm3 }
 0x235   :  { %v548_v49 = vmul.f32 %v5276_v0, %v539_v51  ;;  %v550_v6 = vmul.f32 %v5394_v20, %v539_v51  ;;  %v556_v55 = vmul.f32 %v5367_v16, %v540_v47  ;;  %v558_v17 = vmul.f32 %v5406_v21, %v540_v47  ;;  %vm6463_vm13 = vmmov %vm6458_vm4 }
 0x236   :  { %v532_v29 = vsel %vm6454_vm0, %v4686_v59, %v499_v23  ;;  %v584_v39 = vadd.f32 %v552_v5, %v544_v37  ;;  %v547_v34 = vmul.f32 %v5421_v61, %v539_v51  ;;  %v602_v36 = vadd.f32 %v554_v15, %v546_v1  ;;  %vm6464_vm12 = vmmov %vm6458_vm4 }
 0x237   :  { %v575_v0 = vadd.f32 %v551_v33, %v543_v53  ;;  %v593_v41 = vadd.f32 %v553_v50, %v545_v58  ;;  %v620_v35 = vadd.f32 %v556_v55, %v548_v49  ;;  %v638_v16 = vadd.f32 %v558_v17, %v550_v6  ;;  %vm6465_vm14 = vmmov %vm6454_vm0 }
 0x238   :  { %v521_v13 = vpop.permute.xlu1 %520  ;;  %v497_v14 = vpop.permute.xlu0 %496  ;;  %v549_v47 = vmul.f32 %v5426_v24, %v539_v51  ;;  %vm6467_vm9 = vmmov %vm6460_vm3 }
 0x239   :  { %v531_v43 = vsel %vm6455_vm7, %v4688_v60, %v497_v14  ;;  %vm6468_vm8 = vmmov %vm6458_vm4 }
 0x23a   :  { %v536_v20 = vsel %vm6456_vm15, %v531_v43, %v509_v52  ;;  %vm6469_vm0 = vmmov %vm6460_vm3 }
 0x23b   :  { %v541_v32 = vsel %vm6457_vm6, %v536_v20, %v521_v13  ;;  %vm6470_vm7 = vmmov %vm6458_vm4 }
 0x23c   :  { %v559_v21 = vmul.f32 %v5271_v63, %v541_v32  ;;  %v561_v59 = vmul.f32 %v5297_v3, %v541_v32  ;;  %v523_v23 = vpop.permute.xlu1 %522  ;;  %v511_v60 = vpop.permute.xlu0 %510  ;;  %v560_v37 = vmul.f32 %v5316_v40, %v541_v32  ;;  %v562_v5 = vmul.f32 %v5321_v57, %v541_v32  ;;  %vm6472_vm15 = vmmov %vm6466_vm1 }
 0x23d   :  { %v537_v43 = vsel %vm6431_vm5, %v532_v29, %v511_v60  ;;  %v564_v52 = vmul.f32 %v5372_v62, %v541_v32  ;;  %v566_v20 = vmul.f32 %v5411_v22, %v541_v32  ;;  %v563_v33 = vmul.f32 %v5431_v27, %v541_v32  ;;  %vm6473_vm6 = vmmov %vm6469_vm0 }
 0x23e   :  { %v542_v51 = vsel %vm6458_vm4, %v537_v43, %v523_v23  ;;  %v585_v50 = vadd.f32 %v584_v39, %v560_v37  ;;  %v603_v53 = vadd.f32 %v602_v36, %v562_v5  ;;  %v576_v58 = vadd.f32 %v575_v0, %v559_v21  ;;  %vm6474_vm5 = vmmov %vm6458_vm4 }
 0x23f   :  { %v567_v1 = vmul.f32 %v5334_v8, %v542_v51  ;;  %v569_v49 = vmul.f32 %v5339_v9, %v542_v51  ;;  %v568_v6 = vmul.f32 %v5344_v10, %v542_v51  ;;  %v570_v13 = vmul.f32 %v5349_v11, %v542_v51  ;;  %vm6480_vm4 = vmmov %vm6466_vm1 }
 0x240   :  { %v856_v29 = vpop.permute.xlu1 %855  ;;  %v880_v14 = vpop.permute.xlu0 %879  ;;  %v594_v15 = vadd.f32 %v593_v41, %v561_v59  ;;  %v572_v55 = vmul.f32 %v5389_v18, %v542_v51  ;;  %v621_v17 = vadd.f32 %v620_v35, %v564_v52  ;;  %v574_v60 = vmul.f32 %v5416_v4, %v542_v51 }
 0x241   :  { %v586_v23 = vadd.f32 %v585_v50, %v568_v6  ;;  %v604_v39 = vadd.f32 %v603_v53, %v570_v13  ;;  %v577_v36 = vadd.f32 %v576_v58, %v567_v1  ;;  %v611_v0 = vadd.f32 %v555_v2, %v547_v34 }
 0x242   :  { %v595_v21 = vadd.f32 %v594_v15, %v569_v49  ;;  %v622_v37 = vadd.f32 %v621_v17, %v572_v55  ;;  %v639_v5 = vadd.f32 %v638_v16, %v566_v20  ;;  %v571_v43 = vmul.f32 %v5443_v44, %v542_v51 }
 0x243   :  { %v587_v22 = vrot.slane %v586_v23, 4  ;;  %v605_v27 = vrot.slane %v604_v39, 4  ;;  %v578_v62 = vrot.slane %v577_v36, 4  ;;  %v612_v24 = vadd.f32 %v611_v0, %v563_v33 }
 0x244   :  { %v868_v61 = vpop.permute.xlu1 %867  ;;  %v854_v41 = vpop.permute.xlu0 %853  ;;  %v596_v59 = vrot.slane %v595_v21, 4  ;;  %v623_v18 = vrot.slane %v622_v37, 4  ;;  %v640_v35 = vadd.f32 %v639_v5, %v574_v60  ;;  %v629_v52 = vadd.f32 %v557_v7, %v549_v47 }
 0x245   :  { %v890_v50 = vsel %vm6459_vm11, %v4728_v12, %v856_v29  ;;  %v588_v53 = vadd.f32 %v587_v22, %v586_v23  ;;  %v606_v34 = vadd.f32 %v605_v27, %v604_v39  ;;  %v565_v2 = vmul.f32 %v5436_v28, %v541_v32  ;;  %vm6481_vm11 = vmmov %vm6469_vm0 }
 0x246   :  { %v894_v16 = vsel %vm6460_vm3, %v890_v50, %v868_v61  ;;  %v579_v20 = vadd.f32 %v578_v62, %v577_v36  ;;  %v597_v58 = vadd.f32 %v596_v59, %v595_v21  ;;  %v624_v1 = vadd.f32 %v623_v18, %v622_v37  ;;  %vm6482_vm3 = vmmov %vm6474_vm5 }
 0x247   :  { %v589_v49 = vrot.slane %v588_v53, 2  ;;  %v607_v33 = vrot.slane %v606_v34, 2  ;;  %v641_v6 = vrot.slane %v640_v35, 4  ;;  %v613_v13 = vadd.f32 %v612_v24, %v571_v43 }
 0x248   :  { %v889_v15 = vsel %vm6461_vm2, %v4746_v19, %v854_v41  ;;  %v878_v7 = vpop.permute.xlu1 %877  ;;  %v866_v47 = vpop.permute.xlu0 %865  ;;  %v580_v55 = vrot.slane %v579_v20, 2  ;;  %v598_v12 = vrot.slane %v597_v58, 2  ;;  %v625_v22 = vrot.slane %v624_v1, 2  ;;  %vm6484_vm2 = vmmov %vm6466_vm1 }
 0x249   :  { %v590_v27 = vadd.f32 %v589_v49, %v588_v53  ;;  %v608_v29 = vadd.f32 %v607_v33, %v606_v34  ;;  %v642_v32 = vadd.f32 %v641_v6, %v640_v35  ;;  %v573_v61 = vmul.f32 %v5446_v46, %v542_v51  ;;  %v4237_v49 = vld [vmem:[%s6273_s6 + $0x138] sm:$0xff]  }
 0x24a   :  { %v893_v62 = vsel %vm6462_vm10, %v889_v15, %v866_v47  ;;  %v581_v18 = vadd.f32 %v580_v55, %v579_v20  ;;  %v599_v17 = vadd.f32 %v598_v12, %v597_v58  ;;  %v626_v60 = vadd.f32 %v625_v22, %v624_v1  ;;  %v4239_v47 = vld [vmem:[%s6273_s6 + $0x170] sm:$0xff]   ;;  %vm6488_vm10 = vmmov %vm6469_vm0 }
 0x24b   :  { %v591_v23 = vrot.slane %v590_v27, 1  ;;  %v609_v24 = vrot.slane %v608_v29, 1  ;;  %v643_v39 = vrot.slane %v642_v32, 2  ;;  %v614_v36 = vrot.slane %v613_v13, 4 }
 0x24c   :  { %v870_v19 = vpop.permute.xlu1 %869  ;;  %v860_v0 = vpop.permute.xlu0 %859  ;;  %v582_v21 = vrot.slane %v581_v18, 1  ;;  %v600_v37 = vrot.slane %v599_v17, 1  ;;  %v627_v5 = vrot.slane %v626_v60, 1  ;;  %v630_v43 = vadd.f32 %v629_v52, %v565_v2 }
 0x24d   :  { %v5493_v41 = vsel %vm6463_vm13, %v894_v16, %v880_v14  ;;  %v592_v59 = vadd.f32 %v591_v23, %v590_v27  ;;  %v610_v51 = vadd.f32 %v609_v24, %v608_v29  ;;  %v644_v35 = vadd.f32 %v643_v39, %v642_v32  ;;  %v4238_v14 = vld [vmem:[%s6273_s6 + $0x1b8] sm:$0xff]   ;;  %v4243_v39 = vld [vmem:[%s6273_s6 + $0x168] sm:$0xff]   ;;  %vm6490_vm13 = vmmov %vm6482_vm3 }
 0x24e   :  { %v5496_v50 = vsel %vm6464_vm12, %v893_v62, %v878_v7  ;;  %v583_v53 = vadd.f32 %v582_v21, %v581_v18  ;;  %v601_v34 = vadd.f32 %v600_v37, %v599_v17  ;;  %v628_v20 = vadd.f32 %v627_v5, %v626_v60  ;;  %v4241_v18 = vld [vmem:[%s6273_s6 + $0x130] sm:$0xff]   ;;  %vm6496_vm12 = vmmov %vm6466_vm1 }
 0x24f   :  { %v1364_v58 = vpack.c.bf16 %v592_v59, %v592_v59  ;;  %v1366_v1 = vpack.c.bf16 %v610_v51, %v610_v51  ;;  %v645_v52 = vrot.slane %v644_v35, 1  ;;  %v631_v2 = vadd.f32 %v630_v43, %v573_v61  ;;  %v4242_v17 = vld [vmem:[%s6273_s6 + $0x1b0] sm:$0xff]  }
 0x250   :  { %v892_v16 = vsel %vm6465_vm14, %v4762_v25, %v860_v0  ;;  %v882_v33 = vpop.permute.xlu1 %881  ;;  %v858_v6 = vpop.permute.xlu0 %857  ;;  %v1363_v15 = vpack.c.bf16 %v583_v53, %v583_v53  ;;  %v1365_v7 = vpack.c.bf16 %v601_v34, %v601_v34  ;;  %v5509_v55 = vadd.f32 %v614_v36, %v613_v13  ;;  %v4240_v25 = vld [vmem:[%s6273_s6 + $0x1f0] sm:$0xff]   ;;  %v4244_v36 = vld [vmem:[%s6273_s6 + $0x1e8] sm:$0xff]   ;;  %vm6499_vm14 = vmmov %vm6469_vm0 }
 0x251   :  { %v891_v12 = vsel %vm6466_vm1, %v4764_v26, %v858_v6  ;;  %2956 = vmatprep.mubr.bf16.mxu0 %v1364_v58  ;;  %2996 = vmatprep.mubr.bf16.mxu1 %v1366_v1  ;;  %v646_v22 = vadd.f32 %v645_v52, %v644_v35  ;;  %v632_v27 = vrot.slane %v631_v2, 4  ;;  %v902_v29 = vmul.f32 %v5234_v48, %v5496_v50  ;;  %v4245_v53 = vld [vmem:[%s6273_s6 + $0x128] sm:$0xff]   ;;  %v4247_v52 = vld [vmem:[%s6273_s6 + $0x160] sm:$0xff]   ;;  %vm6502_vm1 = vmmov %vm6482_vm3 }
 0x252   :  { %v895_v32 = vsel %vm6467_vm9, %v891_v12, %v870_v19  ;;  %2957 = vmatmul.mubr.bf16.vlgmr.msra.gmra.mxu0 %v1363_v15  ;;  %2997 = vmatmul.mubr.bf16.vlgmr.msra.gmra.mxu1 %v1365_v7  ;;  %v1368_v13 = vpack.c.bf16 %v628_v20, %v628_v20  ;;  %v910_v61 = vmul.f32 %v5210_v42, %v5493_v41  ;;  %v4246_v34 = vld [vmem:[%s6273_s6 + $0x1a8] sm:$0xff]   ;;  %v616_v20 = vrot.slane %v5509_v55, 2 }
 0x253   :  { %v5522_v26 = vsel %vm6468_vm8, %v895_v32, %v882_v33  ;;  %3887 = vmatpush3.bf16.msra.mxu0 %v4237_v49  ;;  %3909 = vmatpush3.bf16.msra.mxu1 %v4238_v14  ;;  %v1370_v62 = vpack.c.bf16 %v646_v22, %v646_v22  ;;  %v633_v60 = vadd.f32 %v632_v27, %v631_v2  ;;  %v4248_v2 = vld [vmem:[%s6273_s6 + $0x1e0] sm:$0xff]   ;;  %vm4466_vm9 = vmmov 0  }
 0x254   :  { %3036 = vmatprep.mubr.bf16.mxu0 %v1368_v13  ;;  %v884_v23 = vpop.permute.xlu1 %883  ;;  %v872_v24 = vpop.permute.xlu0 %871  ;;  %3888 = vmatprep.subr.bf16.mxu0 %v4239_v47  ;;  %v918_v19 = vmul.f32 %v5316_v40, %v5522_v26  ;;  %v942_v0 = vadd.f32 %v910_v61, %v902_v29  ;;  %v904_v21 = vmul.f32 %v5247_v54, %v5496_v50  ;;  %v4249_v27 = vld [vmem:[%s6273_s6 + $0x120] sm:$0xff]  }
 0x255   :  { %3076 = vmatprep.mubr.bf16.mxu1 %v1370_v62  ;;  %v896_v37 = vsel %vm6469_vm0, %v892_v16, %v872_v24  ;;  %3910 = vmatprep.subr.bf16.mxu1 %v4240_v25  ;;  %v912_v5 = vmul.f32 %v5252_v56, %v5493_v41  ;;  %v920_v51 = vmul.f32 %v5321_v57, %v5522_v26  ;;  %v634_v58 = vrot.slane %v633_v60, 2  ;;  %v4250_v29 = vld [vmem:[%s6273_s6 + $0x1a0] sm:$0xff]   ;;  %v4252_v24 = vld [vmem:[%s6273_s6 + $0x1d8] sm:$0xff]  }
 0x256   :  { %v5544_v43 = vsel %vm6470_vm7, %v896_v37, %v884_v23  ;;  %v943_v59 = vadd.f32 %v942_v0, %v918_v19  ;;  %v901_v35 = vmul.f32 %v5205_v38, %v5496_v50  ;;  %v909_v6 = vmul.f32 %v5157_v30, %v5493_v41  ;;  %v4251_v23 = vld [vmem:[%s6273_s6 + $0x158] sm:$0xff]   ;;  %vm6515_vm7 = vmmov %vm6473_vm6 }
 0x257   :  { %3889 = vmatpush3.bf16.msra.mxu0 %v4241_v18  ;;  %3911 = vmatpush3.bf16.msra.mxu1 %v4242_v17  ;;  %v926_v1 = vmul.f32 %v5344_v10, %v5544_v43  ;;  %v928_v16 = vmul.f32 %v5349_v11, %v5544_v43  ;;  %v960_v33 = vadd.f32 %v912_v5, %v904_v21  ;;  %v4253_v5 = vld [vmem:[%s6273_s6 + $0x118] sm:$0xff]   ;;  %vm3408_vm0 = vcmask 516096  }
 0x258   :  { %v5559_v49 = vpop.permute.xlu1 %1213  ;;  %v5561_v14 = vpop.permute.xlu0 %1237  ;;  %3890 = vmatprep.subr.bf16.mxu0 %v4243_v39  ;;  %3912 = vmatprep.subr.bf16.mxu1 %v4244_v36  ;;  %v917_v7 = vmul.f32 %v5271_v63, %v5522_v26  ;;  %v925_v12 = vmul.f32 %v5334_v8, %v5544_v43  ;;  %v933_v22 = vadd.f32 %v909_v6, %v901_v35 }
 0x259   :  { %v944_v15 = vadd.f32 %v943_v59, %v926_v1  ;;  %v961_v47 = vadd.f32 %v960_v33, %v920_v51  ;;  %v903_v25 = vmul.f32 %v5229_v45, %v5496_v50  ;;  %v617_v32 = vadd.f32 %v616_v20, %v5509_v55  ;;  %v6471_v51 = vld [vmem:[#allocation14_spill] sm:$0xff]  ;;  %v4254_v20 = vld [vmem:[%s6273_s6 + $0x198] sm:$0xff]  }
 0x25a   :  { %v635_v13 = vadd.f32 %v634_v58, %v633_v60  ;;  %v911_v62 = vmul.f32 %v5162_v31, %v5493_v41  ;;  %v934_v36 = vadd.f32 %v933_v22, %v917_v7  ;;  %v919_v55 = vmul.f32 %v5297_v3, %v5522_v26  ;;  %v4255_v58 = vld [vmem:[%s6273_s6 + $0x150] sm:$0xff]  }
 0x25b   :  { %3891 = vmatpush3.bf16.msra.mxu0 %v4245_v53  ;;  %3913 = vmatpush3.bf16.msra.mxu1 %v4246_v34  ;;  %v945_v61 = vrot.slane %v944_v15, 4  ;;  %v962_v39 = vadd.f32 %v961_v47, %v928_v16  ;;  %v927_v60 = vmul.f32 %v5339_v9, %v5544_v43  ;;  %v618_v59 = vrot.slane %v617_v32, 1  ;;  %v4256_v33 = vld [vmem:[%s6273_s6 + $0x1d0] sm:$0xff]  }
 0x25c   :  { %v1226_v18 = vpop.permute.xlu1 %1225  ;;  %v1212_v17 = vpop.permute.xlu0 %1211  ;;  %3892 = vmatprep.subr.bf16.mxu0 %v4247_v52  ;;  %3914 = vmatprep.subr.bf16.mxu1 %v4248_v2  ;;  %v5598_v21 = vadd.f32 %v934_v36, %v925_v12  ;;  %v951_v37 = vadd.f32 %v911_v62, %v903_v25  ;;  %v636_v1 = vrot.slane %v635_v13, 1  ;;  %v6475_v25 = vld [vmem:[#allocation27_spill] sm:$0xff] }
 0x25d   :  { %v946_v19 = vadd.f32 %v945_v61, %v944_v15  ;;  %v963_v0 = vrot.slane %v962_v39, 4  ;;  %v1247_v35 = vsel %vm6472_vm15, %v6471_v51, %v1212_v17  ;;  %v4257_v62 = vld [vmem:[%s6273_s6 + $0x110] sm:$0xff]   ;;  %v5648_v36 = vadd.f32 %v618_v59, %v617_v32 }
 0x25e   :  { %v952_v2 = vadd.f32 %v951_v37, %v919_v55  ;;  %v5650_v55 = vadd.f32 %v636_v1, %v635_v13  ;;  %v4261_v37 = vld [vmem:[%s6273_s6 + $0x108] sm:$0xff]   ;;  %vm3517_vm15 = vcmask 253952  }
 0x25f   :  { %3893 = vmatpush3.bf16.msra.mxu0 %v4249_v27  ;;  %3915 = vmatpush3.bf16.msra.mxu1 %v4250_v29  ;;  %v964_v52 = vadd.f32 %v963_v0, %v962_v39  ;;  %v947_v15 = vrot.slane %v946_v19, 2  ;;  %v6477_v29 = vld [vmem:[#allocation28_spill] sm:$0xff]  ;;  %v4259_v39 = vld [vmem:[%s6273_s6 + $0x148] sm:$0xff]  }
 0x260   :  { %v1224_v53 = vpop.permute.xlu0 %1223  ;;  %v1236_v34 = vpop.permute.xlu1 %1235  ;;  %3894 = vmatprep.subr.bf16.mxu0 %v4251_v23  ;;  %3916 = vmatprep.subr.bf16.mxu1 %v4252_v24  ;;  %v5618_v47 = vadd.f32 %v952_v2, %v927_v60  ;;  %v4258_v24 = vld [vmem:[%s6273_s6 + $0x190] sm:$0xff]   ;;  %v1369_v51 = vpack.c.bf16 %v5650_v55, %v5650_v55  ;;  %v6486_v1 = vld [vmem:[#allocation21_spill] sm:$0xff] }
 0x261   :  { %v1251_v16 = vsel %vm6473_vm6, %v1247_v35, %v1224_v53  ;;  %v965_v7 = vrot.slane %v964_v52, 2  ;;  %v948_v0 = vadd.f32 %v947_v15, %v946_v19  ;;  %v1367_v19 = vpack.c.bf16 %v5648_v36, %v5648_v36  ;;  %v6483_v35 = vld [vmem:[#allocation16_spill] sm:$0xff]  ;;  %v6487_v2 = vld [vmem:[#allocation22_spill] sm:$0xff] }
 0x262   :  { %v5616_v6 = vsel %vm6474_vm5, %v1251_v16, %v1236_v34  ;;  %v4264_v34 = vld [vmem:[%s6273_s6 + $0x1c0] sm:$0xff]   ;;  %v922_v16 = vmul.f32 %v6487_v2, %v5522_v26  ;;  %v6491_v36 = vld [vmem:[#allocation18_spill] sm:$0xff] }
 0x263   :  { %v5622_v12 = vmul.f32 %v5205_v38, %v5616_v6  ;;  %v5626_v22 = vmul.f32 %v5229_v45, %v5616_v6  ;;  %v5630_v27 = vmul.f32 %v6475_v25, %v5616_v6  ;;  %v5634_v61 = vmul.f32 %v6477_v29, %v5616_v6  ;;  %3895 = vmatpush3.bf16.msra.mxu0 %v4253_v5  ;;  %v6479_v38 = vld [vmem:[#allocation13_spill] sm:$0xff] }
 0x264   :  { %v1248_v17 = vsel %vm6480_vm4, %v6479_v38, %v5559_v49  ;;  %3917 = vmatpush3.bf16.msra.mxu1 %v4254_v20  ;;  %v1218_v45 = vpop.permute.xlu0 %1217  ;;  %v1228_v23 = vpop.permute.xlu1 %1227  ;;  %3896 = vmatprep.subr.bf16.mxu0 %v4255_v58  ;;  %v4260_v49 = vld [vmem:[%s6273_s6 + $0x1c8] sm:$0xff]   ;;  %v966_v5 = vadd.f32 %v965_v7, %v964_v52  ;;  %v6485_v20 = vld [vmem:[#allocation20_spill] sm:$0xff]  ;;  %v914_v52 = vmul.f32 %v6486_v1, %v5493_v41  ;;  %v949_v15 = vrot.slane %v948_v0, 1 }
 0x265   :  { %6476 = vst [vmem:[#allocation14_spill] sm:$0xff] %v5630_v27  ;;  %6478 = vst [vmem:[#allocation27_spill] sm:$0xff] %v5634_v61  ;;  %v1252_v60 = vsel %vm6481_vm11, %v1248_v17, %v1226_v18  ;;  %3918 = vmatprep.subr.bf16.mxu1 %v4256_v33  ;;  %v4262_v18 = vld [vmem:[%s6273_s6 + $0x188] sm:$0xff]   ;;  %v906_v58 = vmul.f32 %v6485_v20, %v5496_v50  ;;  %v6489_v7 = vld [vmem:[#allocation24_spill] sm:$0xff]  ;;  %v905_v38 = vmul.f32 %v6475_v25, %v5496_v50 }
 0x266   :  { %v5661_v32 = vsel %vm6482_vm3, %v1252_v60, %v5561_v14  ;;  %v4263_v14 = vld [vmem:[%s6273_s6 + $0x140] sm:$0xff]   ;;  %v913_v55 = vmul.f32 %v6491_v36, %v5493_v41  ;;  %v6500_v27 = vld [vmem:[#allocation26_spill] sm:$0xff]  ;;  %v907_v36 = vmul.f32 %v6477_v29, %v5496_v50  ;;  %v932_v29 = vmul.f32 %v5416_v4, %v5544_v43 }
 0x267   :  { %3897 = vmatpush3.bf16.msra.mxu0 %v4257_v62  ;;  %v908_v62 = vmul.f32 %v6489_v7, %v5496_v50  ;;  %v6498_v7 = vld [vmem:[#allocation25_spill] sm:$0xff]  ;;  %v924_v44 = vmul.f32 %v6500_v27, %v5522_v26 }
 0x268   :  { %3919 = vmatpush3.bf16.msra.mxu1 %v4258_v24  ;;  %v1216_v13 = vpop.permute.xlu0 %1215  ;;  %v1240_v59 = vpop.permute.xlu1 %1239  ;;  %3898 = vmatprep.subr.bf16.mxu0 %v4259_v39  ;;  %v4265_v24 = vld [vmem:[%s6273_s6 + $0x100] sm:$0xff]   ;;  %v967_v39 = vrot.slane %v966_v5, 1 }
 0x269   :  { %v1249_v53 = vsel %vm6484_vm2, %v6483_v35, %v1216_v13  ;;  %3920 = vmatprep.subr.bf16.mxu1 %v4260_v49  ;;  %v4266_v35 = vld [vmem:[%s6273_s6 + $0x180] sm:$0xff]  }
 0x26a   :  { %v1253_v33 = vsel %vm6488_vm10, %v1249_v53, %v1228_v23  ;;  %v6492_v23 = vld [vmem:[#allocation29_spill] sm:$0xff] }
 0x26b   :  { %v5690_v17 = vsel %vm6490_vm13, %v1253_v33, %v1240_v59  ;;  %3899 = vmatpush3.bf16.msra.mxu0 %v4261_v37  ;;  %v921_v60 = vmul.f32 %v6492_v23, %v5522_v26  ;;  %v4268_v33 = vld [vmem:[%s6273_s6 + $0x2f8] sm:$0xff]  }
 0x26c   :  { %v5701_v49 = vmul.f32 %v5271_v63, %v5690_v17  ;;  %v5705_v25 = vmul.f32 %v5297_v3, %v5690_v17  ;;  %v5709_v37 = vmul.f32 %v6492_v23, %v5690_v17  ;;  %v5713_v13 = vmul.f32 %v5436_v28, %v5690_v17  ;;  %3921 = vmatpush3.bf16.msra.mxu1 %v4262_v18  ;;  %v1230_v59 = vpop.permute.xlu0 %1229  ;;  %v4267_v63 = vld [vmem:[%s6273_s6 + $0x278] sm:$0xff]   ;;  %v1242_v46 = vpop.permute.xlu1 %1241 }
 0x26d   :  { %v6495_v3 = vld [vmem:[#allocation15_spill] sm:$0xff]  ;;  %3900 = vmatprep.subr.bf16.mxu0 %v4263_v14  ;;  %3922 = vmatprep.subr.bf16.mxu1 %v4264_v34  ;;  %v968_v34 = vadd.f32 %v967_v39, %v966_v5  ;;  %v1276_v39 = vmul.f32 %v5316_v40, %v5690_v17  ;;  %v4276_v40 = vld [vmem:[%s6273_s6 + $0x2e8] sm:$0xff]  }
 0x26e   :  { %6493 = vst [vmem:[#allocation28_spill] sm:$0xff] %v5709_v37  ;;  %6494 = vst [vmem:[#allocation13_spill] sm:$0xff] %v5713_v13  ;;  %v1250_v53 = vsel %vm6496_vm12, %v6495_v3, %v1218_v45  ;;  %v6497_v18 = vld [vmem:[#allocation23_spill] sm:$0xff]  ;;  %v916_v13 = vmul.f32 %v6498_v7, %v5493_v41  ;;  %v950_v37 = vadd.f32 %v949_v15, %v948_v0 }
 0x26f   :  { %v930_v23 = vmul.f32 %v6497_v18, %v5544_v43  ;;  %v1254_v61 = vsel %vm6499_vm14, %v1250_v53, %v1230_v59  ;;  %v969_v45 = vadd.f32 %v913_v55, %v905_v38  ;;  %3901 = vmatpush3.bf16.msra.mxu0 %v4265_v24  ;;  %v4269_v14 = vld [vmem:[%s6273_s6 + $0x238] sm:$0xff]   ;;  %v978_v3 = vadd.f32 %v914_v52, %v906_v58 }
 0x270   :  { %v6501_v7 = vld [vmem:[#allocation19_spill] sm:$0xff]  ;;  %3923 = vmatpush3.bf16.msra.mxu1 %v4266_v35  ;;  %3930 = vmatprep.subr.bf16.mxu0 %v4267_v63  ;;  %v996_v15 = vadd.f32 %v916_v13, %v908_v62  ;;  %v923_v24 = vmul.f32 %v5436_v28, %v5522_v26  ;;  %v5748_v5 = vsel %vm6502_vm1, %v1254_v61, %v1242_v46  ;;  %v4279_v63 = vld [vmem:[%s6273_s6 + $0x260] sm:$0xff]   ;;  %v936_v53 = vrot.slane %v5598_v21, 4 }
 0x271   :  { %v915_v18 = vmul.f32 %v6501_v7, %v5493_v41  ;;  %v4270_v0 = vld [vmem:[%s6273_s6 + $0x2b8] sm:$0xff]   ;;  %v5743_v38 = vadd.f32 %v969_v45, %v921_v60  ;;  %3952 = vmatprep.subr.bf16.mxu1 %v4268_v33  ;;  %v4271_v41 = vld [vmem:[%s6273_s6 + $0x270] sm:$0xff]   ;;  %v979_v50 = vadd.f32 %v978_v3, %v922_v16  ;;  %v1372_v52 = vpack.c.bf16 %v950_v37, %v950_v37 }
 0x272   :  { %3037 = vmatmul.mubr.bf16.vlgmr.msra.gmra.mxu0 %v1367_v19  ;;  %v4272_v62 = vld [vmem:[%s6273_s6 + $0x2f0] sm:$0xff]   ;;  %v997_v28 = vadd.f32 %v996_v15, %v924_v44  ;;  %v1260_v46 = vmul.f32 %v5234_v48, %v5616_v6  ;;  %v1268_v26 = vmul.f32 %v5210_v42, %v5661_v32  ;;  %v1374_v61 = vpack.c.bf16 %v968_v34, %v968_v34  ;;  %v4275_v42 = vld [vmem:[%s6273_s6 + $0x268] sm:$0xff]  }
 0x273   :  { %v987_v58 = vadd.f32 %v915_v18, %v907_v36  ;;  %3077 = vmatmul.mubr.bf16.vlgmr.msra.gmra.mxu1 %v1369_v51  ;;  %3931 = vmatpush3.bf16.msra.mxu0 %v4269_v14  ;;  %v4273_v16 = vld [vmem:[%s6273_s6 + $0x230] sm:$0xff]   ;;  %v1284_v44 = vmul.f32 %v5344_v10, %v5748_v5  ;;  %v1262_v36 = vmul.f32 %v5247_v54, %v5616_v6  ;;  %v4277_v10 = vld [vmem:[%s6273_s6 + $0x228] sm:$0xff]  }
 0x274   :  { %3116 = vmatprep.mubr.bf16.mxu0 %v1372_v52  ;;  %3953 = vmatpush3.bf16.msra.mxu1 %v4270_v0  ;;  %v4274_v48 = vld [vmem:[%s6273_s6 + $0x2b0] sm:$0xff]   ;;  %v1300_v51 = vadd.f32 %v1268_v26, %v1260_v46  ;;  %v980_v55 = vadd.f32 %v979_v50, %v930_v23  ;;  %v998_v60 = vadd.f32 %v997_v28, %v932_v29  ;;  %v4281_v0 = vld [vmem:[%s6273_s6 + $0x220] sm:$0xff]  }
 0x275   :  { %v5765_v19 = vadd.f32 %v987_v58, %v923_v24  ;;  %3156 = vmatprep.mubr.bf16.mxu1 %v1374_v61  ;;  %3932 = vmatprep.subr.bf16.mxu0 %v4271_v41  ;;  %v1270_v13 = vmul.f32 %v5252_v56, %v5661_v32  ;;  %v1278_v59 = vmul.f32 %v5321_v57, %v5690_v17  ;;  %v4278_v56 = vld [vmem:[%s6273_s6 + $0x2a8] sm:$0xff]   ;;  %v4287_v61 = vld [vmem:[%s6273_s6 + $0x250] sm:$0xff]  }
 0x276   :  { %3954 = vmatprep.subr.bf16.mxu1 %v4272_v62  ;;  %v1301_v37 = vadd.f32 %v1300_v51, %v1276_v39  ;;  %v1286_v35 = vmul.f32 %v5349_v11, %v5748_v5  ;;  %v1267_v54 = vmul.f32 %v5157_v30, %v5661_v32  ;;  %v4280_v30 = vld [vmem:[%s6273_s6 + $0x2e0] sm:$0xff]   ;;  %v954_v11 = vrot.slane %v5618_v47, 4 }
 0x277   :  { %3933 = vmatpush3.bf16.msra.mxu0 %v4273_v16  ;;  %v1318_v57 = vadd.f32 %v1270_v13, %v1262_v36  ;;  %v1283_v18 = vmul.f32 %v5334_v8, %v5748_v5  ;;  %v1269_v45 = vmul.f32 %v5162_v31, %v5661_v32  ;;  %v981_v14 = vrot.slane %v980_v55, 4  ;;  %v4282_v31 = vld [vmem:[%s6273_s6 + $0x2a0] sm:$0xff]   ;;  %v4291_v36 = vld [vmem:[%s6273_s6 + $0x248] sm:$0xff]  }
 0x278   :  { %3955 = vmatpush3.bf16.msra.mxu1 %v4274_v48  ;;  %3934 = vmatprep.subr.bf16.mxu0 %v4275_v42  ;;  %v5800_v33 = vadd.f32 %v1301_v37, %v1284_v44  ;;  %v1291_v23 = vadd.f32 %v1267_v54, %v5622_v12  ;;  %v999_v34 = vrot.slane %v998_v60, 4  ;;  %v1285_v24 = vmul.f32 %v5339_v9, %v5748_v5  ;;  %v4283_v12 = vld [vmem:[%s6273_s6 + $0x258] sm:$0xff]   ;;  %v4289_v42 = vld [vmem:[%s6273_s6 + $0x210] sm:$0xff]   ;;  %v4293_v54 = vld [vmem:[%s6273_s6 + $0x208] sm:$0xff]  }
 0x279   :  { %3956 = vmatprep.subr.bf16.mxu1 %v4276_v40  ;;  %v1319_v3 = vadd.f32 %v1318_v57, %v1278_v59  ;;  %v1309_v8 = vadd.f32 %v1269_v45, %v5626_v22  ;;  %v937_v41 = vadd.f32 %v936_v53, %v5598_v21  ;;  %v4284_v9 = vld [vmem:[%s6273_s6 + $0x2d8] sm:$0xff]   ;;  %v955_v22 = vadd.f32 %v954_v11, %v5618_v47  ;;  %v4290_v40 = vld [vmem:[%s6273_s6 + $0x290] sm:$0xff]   ;;  %v4295_v53 = vld [vmem:[%s6273_s6 + $0x240] sm:$0xff]  }
 0x27a   :  { %v1292_v15 = vadd.f32 %v1291_v23, %v5701_v49  ;;  %v1264_v58 = vmul.f32 %v6485_v20, %v5616_v6  ;;  %v982_v52 = vadd.f32 %v981_v14, %v980_v55  ;;  %v1000_v62 = vadd.f32 %v999_v34, %v998_v60  ;;  %v4285_v21 = vld [vmem:[%s6273_s6 + $0x218] sm:$0xff]   ;;  %v4292_v60 = vld [vmem:[%s6273_s6 + $0x2c8] sm:$0xff]   ;;  %v4296_v45 = vld [vmem:[%s6273_s6 + $0x2c0] sm:$0xff]  }
 0x27b   :  { %3935 = vmatpush3.bf16.msra.mxu0 %v4277_v10  ;;  %v5825_v50 = vadd.f32 %v1319_v3, %v1286_v35  ;;  %v1310_v29 = vadd.f32 %v1309_v8, %v5705_v25  ;;  %v1272_v46 = vmul.f32 %v6486_v1, %v5661_v32  ;;  %v1280_v47 = vmul.f32 %v6487_v2, %v5690_v17  ;;  %v6503_v25 = vld [vmem:[#allocation23_spill] sm:$0xff]  ;;  %v6504_v59 = vld [vmem:[#allocation18_spill] sm:$0xff] }
 0x27c   :  { %3957 = vmatpush3.bf16.msra.mxu1 %v4278_v56  ;;  %3936 = vmatprep.subr.bf16.mxu0 %v4279_v63  ;;  %v5831_v49 = vadd.f32 %v1292_v15, %v1283_v18  ;;  %v1288_v26 = vmul.f32 %v6503_v25, %v5748_v5  ;;  %v4286_v20 = vld [vmem:[%s6273_s6 + $0x298] sm:$0xff]   ;;  %v938_v16 = vrot.slane %v937_v41, 2  ;;  %v4288_v1 = vld [vmem:[%s6273_s6 + $0x2d0] sm:$0xff]   ;;  %v956_v2 = vrot.slane %v955_v22, 2  ;;  %v4294_v63 = vld [vmem:[%s6273_s6 + $0x288] sm:$0xff]  }
 0x27d   :  { %3958 = vmatprep.subr.bf16.mxu1 %v4280_v30  ;;  %v5839_v28 = vadd.f32 %v1310_v29, %v1285_v24  ;;  %v1336_v39 = vadd.f32 %v1272_v46, %v1264_v58  ;;  %v983_v48 = vrot.slane %v982_v52, 2  ;;  %v1001_v44 = vrot.slane %v1000_v62, 2  ;;  %v6505_v30 = vld [vmem:[#allocation30_spill] sm:$0xff]  ;;  %v4297_v24 = vld [vmem:[%s6273_s6 + $0x200] sm:$0xff]   ;;  %v4299_v29 = vld [vmem:[%s6273_s6 + $0x378] sm:$0xff]  }
 0x27e   :  { %v939_v55 = vadd.f32 %v938_v16, %v937_v41  ;;  %v957_v37 = vadd.f32 %v956_v2, %v955_v22  ;;  %v1271_v35 = vmul.f32 %v6504_v59, %v5661_v32  ;;  %v1287_v11 = vmul.f32 %v6505_v30, %v5748_v5  ;;  %v6506_v18 = vld [vmem:[#allocation14_spill] sm:$0xff]  ;;  %v6509_v41 = vld [vmem:[#allocation27_spill] sm:$0xff]  ;;  %v4311_v59 = vld [vmem:[%s6273_s6 + $0x360] sm:$0xff]  }
 0x27f   :  { %3937 = vmatpush3.bf16.msra.mxu0 %v4281_v0  ;;  %v1337_v51 = vadd.f32 %v1336_v39, %v1280_v47  ;;  %v984_v10 = vadd.f32 %v983_v48, %v982_v52  ;;  %v1002_v56 = vadd.f32 %v1001_v44, %v1000_v62  ;;  %v1273_v34 = vmul.f32 %v6501_v7, %v5661_v32  ;;  %v6507_v0 = vld [vmem:[#allocation28_spill] sm:$0xff]  ;;  %v4303_v39 = vld [vmem:[%s6273_s6 + $0x370] sm:$0xff]  }
 0x280   :  { %3959 = vmatpush3.bf16.msra.mxu1 %v4282_v31  ;;  %3938 = vmatprep.subr.bf16.mxu0 %v4283_v12  ;;  %v940_v57 = vrot.slane %v939_v55, 1  ;;  %v1327_v23 = vadd.f32 %v1271_v35, %v6506_v18  ;;  %v958_v14 = vrot.slane %v957_v37, 1  ;;  %v6508_v31 = vld [vmem:[#allocation31_spill] sm:$0xff]  ;;  %v4298_v7 = vld [vmem:[%s6273_s6 + $0x280] sm:$0xff]  }
 0x281   :  { %3960 = vmatprep.subr.bf16.mxu1 %v4284_v9  ;;  %v5868_v13 = vadd.f32 %v1337_v51, %v1288_v26  ;;  %v985_v3 = vrot.slane %v984_v10, 1  ;;  %v1003_v8 = vrot.slane %v1002_v56, 1  ;;  %v1289_v12 = vmul.f32 %v6508_v31, %v5748_v5  ;;  %v4300_v62 = vld [vmem:[%s6273_s6 + $0x3f8] sm:$0xff]   ;;  %v4304_v44 = vld [vmem:[%s6273_s6 + $0x3f0] sm:$0xff]  }
 0x282   :  { %v1328_v15 = vadd.f32 %v1327_v23, %v6507_v0  ;;  %v1345_v9 = vadd.f32 %v1273_v34, %v6509_v41  ;;  %v941_v22 = vadd.f32 %v940_v57, %v939_v55  ;;  %v959_v52 = vadd.f32 %v958_v14, %v957_v37  ;;  %v4301_v25 = vld [vmem:[%s6273_s6 + $0x338] sm:$0xff]   ;;  %v4314_v57 = vld [vmem:[%s6273_s6 + $0x3a0] sm:$0xff]   ;;  %v4319_v0 = vld [vmem:[%s6273_s6 + $0x350] sm:$0xff]  }
 0x283   :  { %3939 = vmatpush3.bf16.msra.mxu0 %v4285_v21  ;;  %v6510_v21 = vld [vmem:[#allocation13_spill] sm:$0xff]  ;;  %v986_v47 = vadd.f32 %v985_v3, %v984_v10  ;;  %v1004_v26 = vadd.f32 %v1003_v8, %v1002_v56  ;;  %v4302_v16 = vld [vmem:[%s6273_s6 + $0x3b8] sm:$0xff]   ;;  %v931_v48 = vmul.f32 %v6508_v31, %v5544_v43  ;;  %v1303_v56 = vrot.slane %v5800_v33, 4 }
 0x284   :  { %3961 = vmatpush3.bf16.msra.mxu1 %v4286_v20  ;;  %3940 = vmatprep.subr.bf16.mxu0 %v4287_v61  ;;  %v5902_v58 = vadd.f32 %v1328_v15, %v1287_v11  ;;  %v1346_v46 = vadd.f32 %v1345_v9, %v6510_v21  ;;  %v1371_v61 = vpack.c.bf16 %v941_v22, %v941_v22  ;;  %v4309_v10 = vld [vmem:[%s6273_s6 + $0x328] sm:$0xff]   ;;  %v4316_v18 = vld [vmem:[%s6273_s6 + $0x3d8] sm:$0xff]  }
 0x285   :  { %3962 = vmatprep.subr.bf16.mxu1 %v4288_v1  ;;  %v929_v1 = vmul.f32 %v6505_v30, %v5544_v43  ;;  %v1373_v2 = vpack.c.bf16 %v959_v52, %v959_v52  ;;  %v1378_v51 = vpack.c.bf16 %v1004_v26, %v1004_v26  ;;  %v4307_v43 = vld [vmem:[%s6273_s6 + $0x368] sm:$0xff]   ;;  %v989_v37 = vadd.f32 %v5765_v19, %v931_v48  ;;  %v4312_v19 = vld [vmem:[%s6273_s6 + $0x3e0] sm:$0xff]   ;;  %v4315_v30 = vld [vmem:[%s6273_s6 + $0x358] sm:$0xff]  }
 0x286   :  { %v5911_v20 = vadd.f32 %v1346_v46, %v1289_v12  ;;  %v4317_v14 = vld [vmem:[%s6273_s6 + $0x318] sm:$0xff]   ;;  %v4322_v12 = vld [vmem:[%s6273_s6 + $0x390] sm:$0xff]   ;;  %v4323_v41 = vld [vmem:[%s6273_s6 + $0x348] sm:$0xff]  }
 0x287   :  { %3941 = vmatpush3.bf16.msra.mxu0 %v4289_v42  ;;  %v1376_v42 = vpack.c.bf16 %v986_v47, %v986_v47  ;;  %v971_v55 = vadd.f32 %v5743_v38, %v929_v1  ;;  %v4310_v38 = vld [vmem:[%s6273_s6 + $0x3a8] sm:$0xff]   ;;  %v4318_v3 = vld [vmem:[%s6273_s6 + $0x398] sm:$0xff]   ;;  %v4327_v46 = vld [vmem:[%s6273_s6 + $0x340] sm:$0xff]  }
 0x288   :  { %3963 = vmatpush3.bf16.msra.mxu1 %v4290_v40  ;;  %3942 = vmatprep.subr.bf16.mxu0 %v4291_v36  ;;  %v4305_v40 = vld [vmem:[%s6273_s6 + $0x330] sm:$0xff]   ;;  %v4325_v52 = vld [vmem:[%s6273_s6 + $0x308] sm:$0xff]   ;;  %v4331_v48 = vld [vmem:[%s6273_s6 + $0x478] sm:$0xff]  }
 0x289   :  { %3964 = vmatprep.subr.bf16.mxu1 %v4292_v60  ;;  %v4306_v36 = vld [vmem:[%s6273_s6 + $0x3b0] sm:$0xff]   ;;  %v4308_v60 = vld [vmem:[%s6273_s6 + $0x3e8] sm:$0xff]   ;;  %v972_v35 = vrot.slane %v971_v55, 4 }
 0x28a   :  { %v4326_v21 = vld [vmem:[%s6273_s6 + $0x388] sm:$0xff]  }
 0x28b   :  { %3943 = vmatpush3.bf16.msra.mxu0 %v4293_v54  ;;  %v990_v54 = vrot.slane %v989_v37, 4  ;;  %v973_v11 = vadd.f32 %v972_v35, %v971_v55  ;;  %v4335_v35 = vld [vmem:[%s6273_s6 + $0x470] sm:$0xff]  }
 0x28c   :  { %3965 = vmatpush3.bf16.msra.mxu1 %v4294_v63  ;;  %3944 = vmatprep.subr.bf16.mxu0 %v4295_v53  ;;  %v4313_v63 = vld [vmem:[%s6273_s6 + $0x320] sm:$0xff]   ;;  %v1321_v53 = vrot.slane %v5825_v50, 4 }
 0x28d   :  { %3966 = vmatprep.subr.bf16.mxu1 %v4296_v45  ;;  %v991_v23 = vadd.f32 %v990_v54, %v989_v37  ;;  %v1304_v45 = vadd.f32 %v1303_v56, %v5800_v33  ;;  %v974_v15 = vrot.slane %v973_v11, 2  ;;  %v4320_v33 = vld [vmem:[%s6273_s6 + $0x3d0] sm:$0xff]   ;;  %v1290_v56 = vmul.f32 %v5416_v4, %v5748_v5  ;;  %v4341_v4 = vld [vmem:[%s6273_s6 + $0x428] sm:$0xff]  }
 0x28e   :  { %v1322_v34 = vadd.f32 %v1321_v53, %v5825_v50  ;;  %v4321_v50 = vld [vmem:[%s6273_s6 + $0x310] sm:$0xff]  }
 0x28f   :  { %3945 = vmatpush3.bf16.msra.mxu0 %v4297_v24  ;;  %v992_v24 = vrot.slane %v991_v23, 2  ;;  %v1305_v8 = vrot.slane %v1304_v45, 2  ;;  %v975_v9 = vadd.f32 %v974_v15, %v973_v11  ;;  %v4338_v53 = vld [vmem:[%s6273_s6 + $0x4b0] sm:$0xff]   ;;  %v4342_v11 = vld [vmem:[%s6273_s6 + $0x4a8] sm:$0xff]   ;;  %v4346_v15 = vld [vmem:[%s6273_s6 + $0x4a0] sm:$0xff]  }
 0x290   :  { %3967 = vmatpush3.bf16.msra.mxu1 %v4298_v7  ;;  %3974 = vmatprep.subr.bf16.mxu0 %v4299_v29  ;;  %v1323_v31 = vrot.slane %v1322_v34, 2  ;;  %v4324_v7 = vld [vmem:[%s6273_s6 + $0x3c8] sm:$0xff]  }
 0x291   :  { %3996 = vmatprep.subr.bf16.mxu1 %v4300_v62  ;;  %v993_v22 = vadd.f32 %v992_v24, %v991_v23  ;;  %v1306_v29 = vadd.f32 %v1305_v8, %v1304_v45  ;;  %v976_v47 = vrot.slane %v975_v9, 1  ;;  %v1294_v23 = vrot.slane %v5831_v49, 4  ;;  %v4344_v45 = vld [vmem:[%s6273_s6 + $0x4e0] sm:$0xff]   ;;  %v4348_v8 = vld [vmem:[%s6273_s6 + $0x4d8] sm:$0xff]  }
 0x292   :  { %3117 = vmatmul.mubr.bf16.vlgmr.msra.gmra.mxu0 %v1371_v61  ;;  %v1324_v62 = vadd.f32 %v1323_v31, %v1322_v34  ;;  %v1339_v34 = vrot.slane %v5868_v13, 4 }
 0x293   :  { %3157 = vmatmul.mubr.bf16.vlgmr.msra.gmra.mxu1 %v1373_v2  ;;  %3975 = vmatpush3.bf16.msra.mxu0 %v4301_v25  ;;  %v4328_v25 = vld [vmem:[%s6273_s6 + $0x3c0] sm:$0xff]   ;;  %v994_v26 = vrot.slane %v993_v22, 1  ;;  %v1307_v61 = vrot.slane %v1306_v29, 1  ;;  %v1295_v24 = vadd.f32 %v1294_v23, %v5831_v49  ;;  %v4350_v49 = vld [vmem:[%s6273_s6 + $0x498] sm:$0xff]   ;;  %v1348_v23 = vrot.slane %v5911_v20, 4 }
 0x294   :  { %3196 = vmatprep.mubr.bf16.mxu0 %v1376_v42  ;;  %3997 = vmatpush3.bf16.msra.mxu1 %v4302_v16  ;;  %v4329_v16 = vld [vmem:[%s6273_s6 + $0x300] sm:$0xff]   ;;  %v1325_v1 = vrot.slane %v1324_v62, 1  ;;  %v1340_v31 = vadd.f32 %v1339_v34, %v5868_v13  ;;  %v4379_v34 = vld [vmem:[%s6273_s6 + $0x558] sm:$0xff]  }
 0x295   :  { %3236 = vmatprep.mubr.bf16.mxu1 %v1378_v51  ;;  %3976 = vmatprep.subr.bf16.mxu0 %v4303_v39  ;;  %v4330_v2 = vld [vmem:[%s6273_s6 + $0x380] sm:$0xff]   ;;  %v977_v39 = vadd.f32 %v976_v47, %v975_v9  ;;  %v995_v42 = vadd.f32 %v994_v26, %v993_v22  ;;  %v4351_v9 = vld [vmem:[%s6273_s6 + $0x450] sm:$0xff]   ;;  %v4356_v47 = vld [vmem:[%s6273_s6 + $0x4c8] sm:$0xff]  }
 0x296   :  { %3998 = vmatprep.subr.bf16.mxu1 %v4304_v44  ;;  %v4332_v44 = vld [vmem:[%s6273_s6 + $0x4f8] sm:$0xff]   ;;  %v1326_v55 = vadd.f32 %v1325_v1, %v1324_v62  ;;  %v1341_v22 = vrot.slane %v1340_v31, 2  ;;  %v4354_v62 = vld [vmem:[%s6273_s6 + $0x490] sm:$0xff]   ;;  %v4358_v1 = vld [vmem:[%s6273_s6 + $0x488] sm:$0xff]  }
 0x297   :  { %3977 = vmatpush3.bf16.msra.mxu0 %v4305_v40  ;;  %v6511_v51 = vld [vmem:[#allocation24_spill] sm:$0xff] }
 0x298   :  { %3999 = vmatpush3.bf16.msra.mxu1 %v4306_v36  ;;  %3978 = vmatprep.subr.bf16.mxu0 %v4307_v43  ;;  %v1266_v40 = vmul.f32 %v6511_v51, %v5616_v6  ;;  %v1308_v36 = vadd.f32 %v1307_v61, %v1306_v29  ;;  %v4333_v43 = vld [vmem:[%s6273_s6 + $0x438] sm:$0xff]   ;;  %v4353_v29 = vld [vmem:[%s6273_s6 + $0x410] sm:$0xff]   ;;  %v1342_v26 = vadd.f32 %v1341_v22, %v1340_v31  ;;  %v4357_v61 = vld [vmem:[%s6273_s6 + $0x408] sm:$0xff]  }
 0x299   :  { %4000 = vmatprep.subr.bf16.mxu1 %v4308_v60  ;;  %v6512_v60 = vld [vmem:[#allocation25_spill] sm:$0xff]  ;;  %v4334_v6 = vld [vmem:[%s6273_s6 + $0x4b8] sm:$0xff]   ;;  %v4385_v31 = vld [vmem:[%s6273_s6 + $0x510] sm:$0xff]  }
 0x29a   :  { %v1274_v37 = vmul.f32 %v6512_v60, %v5661_v32  ;;  %v1380_v54 = vpack.c.bf16 %v1308_v36, %v1308_v36  ;;  %v1382_v32 = vpack.c.bf16 %v1326_v55, %v1326_v55  ;;  %v4361_v51 = vld [vmem:[%s6273_s6 + $0x400] sm:$0xff]   ;;  %v4363_v55 = vld [vmem:[%s6273_s6 + $0x578] sm:$0xff]  }
 0x29b   :  { %3979 = vmatpush3.bf16.msra.mxu0 %v4309_v10  ;;  %v1282_v10 = vmul.f32 %v6500_v27, %v5690_v17  ;;  %v4336_v27 = vld [vmem:[%s6273_s6 + $0x4f0] sm:$0xff]   ;;  %v4362_v36 = vld [vmem:[%s6273_s6 + $0x480] sm:$0xff]  }
 0x29c   :  { %4001 = vmatpush3.bf16.msra.mxu1 %v4310_v38  ;;  %3980 = vmatprep.subr.bf16.mxu0 %v4311_v59  ;;  %v1375_v38 = vpack.c.bf16 %v977_v39, %v977_v39  ;;  %v1377_v59 = vpack.c.bf16 %v995_v42, %v995_v42  ;;  %v4337_v17 = vld [vmem:[%s6273_s6 + $0x430] sm:$0xff]   ;;  %v4391_v22 = vld [vmem:[%s6273_s6 + $0x540] sm:$0xff]  }
 0x29d   :  { %4002 = vmatprep.subr.bf16.mxu1 %v4312_v19  ;;  %v1354_v19 = vadd.f32 %v1274_v37, %v1266_v40  ;;  %v4364_v37 = vld [vmem:[%s6273_s6 + $0x5f8] sm:$0xff]  }
 0x29f   :  { %3981 = vmatpush3.bf16.msra.mxu0 %v4313_v63  ;;  %v1355_v63 = vadd.f32 %v1354_v19, %v1282_v10 }
 0x2a0   :  { %4003 = vmatpush3.bf16.msra.mxu1 %v4314_v57  ;;  %3982 = vmatprep.subr.bf16.mxu0 %v4315_v30  ;;  %v4339_v57 = vld [vmem:[%s6273_s6 + $0x468] sm:$0xff]  }
 0x2a1   :  { %4004 = vmatprep.subr.bf16.mxu1 %v4316_v18  ;;  %v4340_v30 = vld [vmem:[%s6273_s6 + $0x4e8] sm:$0xff]   ;;  %v1356_v5 = vadd.f32 %v1355_v63, %v1290_v56  ;;  %v4343_v18 = vld [vmem:[%s6273_s6 + $0x460] sm:$0xff]   ;;  %v4369_v56 = vld [vmem:[%s6273_s6 + $0x530] sm:$0xff]  }
 0x2a2   :  { %v4370_v63 = vld [vmem:[%s6273_s6 + $0x5b0] sm:$0xff]  }
 0x2a3   :  { %3983 = vmatpush3.bf16.msra.mxu0 %v4317_v14  ;;  %v1312_v14 = vrot.slane %v5839_v28, 4 }
 0x2a4   :  { %4005 = vmatpush3.bf16.msra.mxu1 %v4318_v3  ;;  %3984 = vmatprep.subr.bf16.mxu0 %v4319_v0  ;;  %v4345_v3 = vld [vmem:[%s6273_s6 + $0x420] sm:$0xff]   ;;  %v1357_v0 = vrot.slane %v1356_v5, 4 }
 0x2a5   :  { %4006 = vmatprep.subr.bf16.mxu1 %v4320_v33  ;;  %v4347_v33 = vld [vmem:[%s6273_s6 + $0x458] sm:$0xff]  }
 0x2a7   :  { %3985 = vmatpush3.bf16.msra.mxu0 %v4321_v50  ;;  %v1313_v50 = vadd.f32 %v1312_v14, %v5839_v28  ;;  %v4352_v28 = vld [vmem:[%s6273_s6 + $0x4d0] sm:$0xff]   ;;  %v4378_v14 = vld [vmem:[%s6273_s6 + $0x5a0] sm:$0xff]  }
 0x2a8   :  { %4007 = vmatpush3.bf16.msra.mxu1 %v4322_v12  ;;  %3986 = vmatprep.subr.bf16.mxu0 %v4323_v41  ;;  %v4349_v12 = vld [vmem:[%s6273_s6 + $0x418] sm:$0xff]   ;;  %v1358_v41 = vadd.f32 %v1357_v0, %v1356_v5  ;;  %v4375_v5 = vld [vmem:[%s6273_s6 + $0x560] sm:$0xff]  }
 0x2a9   :  { %4008 = vmatprep.subr.bf16.mxu1 %v4324_v7  ;;  %v1296_v7 = vrot.slane %v1295_v24, 2  ;;  %v1314_v13 = vrot.slane %v1313_v50, 2  ;;  %v4380_v0 = vld [vmem:[%s6273_s6 + $0x5d8] sm:$0xff]  }
 0x2ab   :  { %3987 = vmatpush3.bf16.msra.mxu0 %v4325_v52  ;;  %v1359_v52 = vrot.slane %v1358_v41, 2 }
 0x2ac   :  { %4009 = vmatpush3.bf16.msra.mxu1 %v4326_v21  ;;  %3988 = vmatprep.subr.bf16.mxu0 %v4327_v46  ;;  %v4355_v21 = vld [vmem:[%s6273_s6 + $0x448] sm:$0xff]   ;;  %v1297_v46 = vadd.f32 %v1296_v7, %v1295_v24  ;;  %v4382_v24 = vld [vmem:[%s6273_s6 + $0x598] sm:$0xff]  }
 0x2ad   :  { %4010 = vmatprep.subr.bf16.mxu1 %v4328_v25  ;;  %v1315_v25 = vadd.f32 %v1314_v13, %v1313_v50  ;;  %v4390_v13 = vld [vmem:[%s6273_s6 + $0x588] sm:$0xff]  }
 0x2ae   :  { %v1298_v39 = vrot.slane %v1297_v46, 1 }
 0x2af   :  { %3989 = vmatpush3.bf16.msra.mxu0 %v4329_v16  ;;  %v1360_v16 = vadd.f32 %v1359_v52, %v1358_v41  ;;  %v1316_v42 = vrot.slane %v1315_v25, 1  ;;  %v4387_v41 = vld [vmem:[%s6273_s6 + $0x548] sm:$0xff]   ;;  %v4392_v52 = vld [vmem:[%s6273_s6 + $0x5c0] sm:$0xff]  }
 0x2b0   :  { %4011 = vmatpush3.bf16.msra.mxu1 %v4330_v2  ;;  %4018 = vmatprep.subr.bf16.mxu0 %v4331_v48  ;;  %v4359_v2 = vld [vmem:[%s6273_s6 + $0x440] sm:$0xff]  }
 0x2b1   :  { %4040 = vmatprep.subr.bf16.mxu1 %v4332_v44  ;;  %v4360_v48 = vld [vmem:[%s6273_s6 + $0x4c0] sm:$0xff]   ;;  %v1343_v44 = vrot.slane %v1342_v26, 1  ;;  %v1361_v40 = vrot.slane %v1360_v16, 1  ;;  %v1317_v60 = vadd.f32 %v1316_v42, %v1315_v25 }
 0x2b2   :  { %3197 = vmatmul.mubr.bf16.vlgmr.msra.gmra.mxu0 %v1375_v38  ;;  %v4365_v38 = vld [vmem:[%s6273_s6 + $0x538] sm:$0xff]  }
 0x2b3   :  { %3237 = vmatmul.mubr.bf16.vlgmr.msra.gmra.mxu1 %v1377_v59  ;;  %4019 = vmatpush3.bf16.msra.mxu0 %v4333_v43  ;;  %v1299_v43 = vadd.f32 %v1298_v39, %v1297_v46  ;;  %v1344_v10 = vadd.f32 %v1343_v44, %v1342_v26  ;;  %v1381_v19 = vpack.c.bf16 %v1317_v60, %v1317_v60  ;;  %v4394_v46 = vld [vmem:[%s6273_s6 + $0x580] sm:$0xff]  }
 0x2b4   :  { %3276 = vmatprep.mubr.bf16.mxu0 %v1380_v54  ;;  %4041 = vmatpush3.bf16.msra.mxu1 %v4334_v6  ;;  %v1362_v6 = vadd.f32 %v1361_v40, %v1360_v16  ;;  %v4367_v54 = vld [vmem:[%s6273_s6 + $0x570] sm:$0xff]   ;;  %v1771_v39 = vld [vmem:[%s6274_s7] sm:$0x1] }
 0x2b5   :  { %3316 = vmatprep.mubr.bf16.mxu1 %v1382_v32  ;;  %4020 = vmatprep.subr.bf16.mxu0 %v4335_v35  ;;  %v1379_v59 = vpack.c.bf16 %v1299_v43, %v1299_v43  ;;  %v4366_v35 = vld [vmem:[%s6273_s6 + $0x5b8] sm:$0xff]   ;;  %v4368_v32 = vld [vmem:[%s6273_s6 + $0x5f0] sm:$0xff]  }
 0x2b6   :  { %4042 = vmatprep.subr.bf16.mxu1 %v4336_v27  ;;  %v1384_v27 = vpack.c.bf16 %v1344_v10, %v1344_v10 }
 0x2b7   :  { %4021 = vmatpush3.bf16.msra.mxu0 %v4337_v17  ;;  %v1386_v17 = vpack.c.bf16 %v1362_v6, %v1362_v6 }
 0x2b8   :  { %4043 = vmatpush3.bf16.msra.mxu1 %v4338_v53  ;;  %4022 = vmatprep.subr.bf16.mxu0 %v4339_v57  ;;  %v4371_v53 = vld [vmem:[%s6273_s6 + $0x568] sm:$0xff]  }
 0x2b9   :  { %4044 = vmatprep.subr.bf16.mxu1 %v4340_v30  ;;  %v4372_v57 = vld [vmem:[%s6273_s6 + $0x5e8] sm:$0xff]  }
 0x2ba   :  { %v4373_v30 = vld [vmem:[%s6273_s6 + $0x528] sm:$0xff]  }
 0x2bb   :  { %4023 = vmatpush3.bf16.msra.mxu0 %v4341_v4  ;;  %v4374_v4 = vld [vmem:[%s6273_s6 + $0x5a8] sm:$0xff]  }
 0x2bc   :  { %4045 = vmatpush3.bf16.msra.mxu1 %v4342_v11  ;;  %4024 = vmatprep.subr.bf16.mxu0 %v4343_v18  ;;  %v1330_v11 = vrot.slane %v5902_v58, 4  ;;  %v4376_v18 = vld [vmem:[%s6273_s6 + $0x5e0] sm:$0xff]  }
 0x2bd   :  { %4046 = vmatprep.subr.bf16.mxu1 %v4344_v45  ;;  %v4377_v45 = vld [vmem:[%s6273_s6 + $0x520] sm:$0xff]  }
 0x2bf   :  { %4025 = vmatpush3.bf16.msra.mxu0 %v4345_v3  ;;  %v1331_v3 = vadd.f32 %v1330_v11, %v5902_v58  ;;  %v4383_v58 = vld [vmem:[%s6273_s6 + $0x550] sm:$0xff]  }
 0x2c0   :  { %4047 = vmatpush3.bf16.msra.mxu1 %v4346_v15  ;;  %4026 = vmatprep.subr.bf16.mxu0 %v4347_v33  ;;  %v1349_v15 = vadd.f32 %v1348_v23, %v5911_v20  ;;  %v4381_v33 = vld [vmem:[%s6273_s6 + $0x518] sm:$0xff]   ;;  %v4384_v20 = vld [vmem:[%s6273_s6 + $0x5d0] sm:$0xff]   ;;  %v3435_v23 = vld [vmem:[%s6275_s8] sm:$0xff] }
 0x2c1   :  { %4048 = vmatprep.subr.bf16.mxu1 %v4348_v8  ;;  %v1332_v8 = vrot.slane %v1331_v3, 2  ;;  %v3437_v11 = vld [vmem:[%s6275_s8 + $0x10] sm:$0xff] }
 0x2c2   :  { %v1350_v50 = vrot.slane %v1349_v15, 2 }
 0x2c3   :  { %4027 = vmatpush3.bf16.msra.mxu0 %v4349_v12  ;;  %v4386_v12 = vld [vmem:[%s6273_s6 + $0x590] sm:$0xff]  }
 0x2c4   :  { %4049 = vmatpush3.bf16.msra.mxu1 %v4350_v49  ;;  %4028 = vmatprep.subr.bf16.mxu0 %v4351_v9  ;;  %v1333_v49 = vadd.f32 %v1332_v8, %v1331_v3  ;;  %v4388_v9 = vld [vmem:[%s6273_s6 + $0x5c8] sm:$0xff]   ;;  %v1351_v7 = vadd.f32 %v1350_v50, %v1349_v15 }
 0x2c5   :  { %4050 = vmatprep.subr.bf16.mxu1 %v4352_v28  ;;  %v4389_v28 = vld [vmem:[%s6273_s6 + $0x508] sm:$0xff]  }
 0x2c7   :  { %4029 = vmatpush3.bf16.msra.mxu0 %v4353_v29  ;;  %v1334_v29 = vrot.slane %v1333_v49, 1 }
 0x2c8   :  { %4051 = vmatpush3.bf16.msra.mxu1 %v4354_v62  ;;  %4030 = vmatprep.subr.bf16.mxu0 %v4355_v21  ;;  %v1352_v62 = vrot.slane %v1351_v7, 1  ;;  %v4393_v21 = vld [vmem:[%s6273_s6 + $0x500] sm:$0xff]  }
 0x2c9   :  { %4052 = vmatprep.subr.bf16.mxu1 %v4356_v47  ;;  %v1335_v47 = vadd.f32 %v1334_v29, %v1333_v49 }
 0x2ca   :  { %v1353_v25 = vadd.f32 %v1352_v62, %v1351_v7 }
 0x2cb   :  { %4031 = vmatpush3.bf16.msra.mxu0 %v4357_v61  ;;  %v1383_v26 = vpack.c.bf16 %v1335_v47, %v1335_v47  ;;  %v6513_v61 = vmov 0.0  }
 0x2cc   :  { %4053 = vmatpush3.bf16.msra.mxu1 %v4358_v1  ;;  %4032 = vmatprep.subr.bf16.mxu0 %v4359_v2  ;;  %v1385_v16 = vpack.c.bf16 %v1353_v25, %v1353_v25 }
 0x2cd   :  { %4054 = vmatprep.subr.bf16.mxu1 %v4360_v48 }
 0x2cf   :  { %4033 = vmatpush3.bf16.msra.mxu0 %v4361_v51 }
 0x2d0   :  { %4055 = vmatpush3.bf16.msra.mxu1 %v4362_v36  ;;  %4062 = vmatprep.subr.bf16.mxu0 %v4363_v55 }
 0x2d1   :  { %4084 = vmatprep.subr.bf16.mxu1 %v4364_v37 }
 0x2d2   :  { %3277 = vmatmul.mubr.bf16.vlgmr.msra.gmra.mxu0 %v1379_v59 }
 0x2d3   :  { %3317 = vmatmul.mubr.bf16.vlgmr.msra.gmra.mxu1 %v1381_v19  ;;  %4063 = vmatpush3.bf16.msra.mxu0 %v4365_v38 }
 0x2d4   :  { %3356 = vmatprep.mubr.bf16.mxu0 %v1384_v27  ;;  %4085 = vmatpush3.bf16.msra.mxu1 %v4366_v35 }
 0x2d5   :  { %3396 = vmatprep.mubr.bf16.mxu1 %v1386_v17  ;;  %4064 = vmatprep.subr.bf16.mxu0 %v4367_v54 }
 0x2d6   :  { %4086 = vmatprep.subr.bf16.mxu1 %v4368_v32 }
 0x2d7   :  { %4065 = vmatpush3.bf16.msra.mxu0 %v4369_v56 }
 0x2d8   :  { %4087 = vmatpush3.bf16.msra.mxu1 %v4370_v63  ;;  %4066 = vmatprep.subr.bf16.mxu0 %v4371_v53  ;;  %v3442_v53 = vld [vmem:[%s6275_s8 + $0x38] sm:$0xff] }
 0x2d9   :  { %4088 = vmatprep.subr.bf16.mxu1 %v4372_v57  ;;  %v3441_v57 = vld [vmem:[%s6275_s8 + $0x30] sm:$0xff] }
 0x2db   :  { %4067 = vmatpush3.bf16.msra.mxu0 %v4373_v30  ;;  %v3440_v30 = vld [vmem:[%s6275_s8 + $0x28] sm:$0xff] }
 0x2dc   :  { %4089 = vmatpush3.bf16.msra.mxu1 %v4374_v4  ;;  %4068 = vmatprep.subr.bf16.mxu0 %v4375_v5  ;;  %v3439_v4 = vld [vmem:[%s6275_s8 + $0x20] sm:$0xff]  ;;  %v3438_v5 = vld [vmem:[%s6275_s8 + $0x18] sm:$0xff] }
 0x2dd   :  { %4090 = vmatprep.subr.bf16.mxu1 %v4376_v18  ;;  %v3436_v18 = vld [vmem:[%s6275_s8 + $0x8] sm:$0xff]  ;;  %s3803_s8 = sld [smem:[#allocation8 + $0x1]] }
 0x2df   :  { %4069 = vmatpush3.bf16.msra.mxu0 %v4377_v45 }
 0x2e0   :  { %4091 = vmatpush3.bf16.msra.mxu1 %v4378_v14  ;;  %4070 = vmatprep.subr.bf16.mxu0 %v4379_v34 }
 0x2e1   :  { %4092 = vmatprep.subr.bf16.mxu1 %v4380_v0 }
 0x2e3   :  { %4071 = vmatpush3.bf16.msra.mxu0 %v4381_v33 }
 0x2e4   :  { %4093 = vmatpush3.bf16.msra.mxu1 %v4382_v24  ;;  %4072 = vmatprep.subr.bf16.mxu0 %v4383_v58 }
 0x2e5   :  { %4094 = vmatprep.subr.bf16.mxu1 %v4384_v20 }
 0x2e7   :  { %4073 = vmatpush3.bf16.msra.mxu0 %v4385_v31 }
 0x2e8   :  { %4095 = vmatpush3.bf16.msra.mxu1 %v4386_v12  ;;  %4074 = vmatprep.subr.bf16.mxu0 %v4387_v41 }
 0x2e9   :  { %4096 = vmatprep.subr.bf16.mxu1 %v4388_v9 }
 0x2eb   :  { %4075 = vmatpush3.bf16.msra.mxu0 %v4389_v28 }
 0x2ec   :  { %4097 = vmatpush3.bf16.msra.mxu1 %v4390_v13  ;;  %4076 = vmatprep.subr.bf16.mxu0 %v4391_v22 }
 0x2ed   :  { %4098 = vmatprep.subr.bf16.mxu1 %v4392_v52 }
 0x2ef   :  { %4077 = vmatpush3.bf16.msra.mxu0 %v4393_v21 }
 0x2f0   :  { %4099 = vmatpush3.bf16.msra.mxu1 %v4394_v46  ;;  %4175 = vmatprep.subr.mxu0 %v6513_v61 }
 0x2f2   :  { %3357 = vmatmul.mubr.bf16.vlgmr.msra.gmra.mxu0 %v1383_v26 }
 0x2f3   :  { %3397 = vmatmul.mubr.bf16.vlgmr.msra.gmra.mxu1 %v1385_v16  ;;  %4176 = vmatpush3.msra.mxu0 %v3442_v53  ;;  %v3427_v53 = vstv %s3804_s29 }
 0x2f4   :  { %4191 = vmatprep.mubr.msk.f32.mxu0 %vm4466_vm9, %v6513_v61  ;;  %4177 = vmatprep.subr.mxu0 %v6513_v61 }
 0x2f5   :  { %4178 = vmatpush3.msra.mxu0 %v3441_v57 }
 0x2f6   :  { %4179 = vmatprep.subr.mxu0 %v6513_v61 }
 0x2f7   :  { %4180 = vmatpush3.msra.mxu0 %v3440_v30 }
 0x2f8   :  { %4181 = vmatprep.subr.mxu0 %v6513_v61 }
 0x2f9   :  { %4182 = vmatpush3.msra.mxu0 %v3439_v4 }
 0x2fa   :  { %4183 = vmatprep.subr.mxu0 %v6513_v61 }
 0x2fb   :  { %4184 = vmatpush3.msra.mxu0 %v3438_v5 }
 0x2fc   :  { %4185 = vmatprep.subr.mxu0 %v6513_v61 }
 0x2fd   :  { %4186 = vmatpush3.msra.mxu0 %v3437_v11 }
 0x2fe   :  { %4187 = vmatprep.subr.mxu0 %v6513_v61 }
 0x2ff   :  { %4188 = vmatpush3.msra.mxu0 %v3436_v18 }
 0x300   :  { %4189 = vmatprep.subr.mxu0 %v6513_v61 }
 0x301   :  { %4190 = vmatpush3.msra.mxu0 %v3435_v23  ;;  %v3433_v23 = vld [vmem:[%s6277_s10] sm:$0x1] }
 0x312   :  { %v3858_v1 = vpop.f32.mrf.mxu0  ;;  %v3880_v2 = vpop.f32.mrf.mxu1 }
 0x314   :  { %v3859_v48 = vpop.f32.mrf.mxu0  ;;  %v3881_v42 = vpop.f32.mrf.mxu1 }
 0x315   :  { %v3860_v44 = vadd.f32 %v3859_v48, %v3858_v1  ;;  %v3882_v51 = vadd.f32 %v3881_v42, %v3880_v2 }
 0x316   :  { %v3861_v40 = vpop.f32.mrf.mxu0  ;;  %v3883_v36 = vpop.f32.mrf.mxu1 }
 0x317   :  { %v2959_v43 = vadd.f32 %v3860_v44, %v1771_v39 }
 0x318   :  { %v3862_v55 = vpop.f32.mrf.mxu0  ;;  %v3884_v60 = vpop.f32.mrf.mxu1 }
 0x319   :  { %v2999_v37 = vadd.f32 %v3882_v51, %v2959_v43 }
 0x332   :  { %v3902_v10 = vpop.f32.mrf.mxu0 }
 0x333   :  { %v3924_v38 = vpop.f32.mrf.mxu1 }
 0x334   :  { %v3903_v6 = vpop.f32.mrf.mxu0 }
 0x335   :  { %v3904_v59 = vadd.f32 %v3903_v6, %v3902_v10  ;;  %v3925_v35 = vpop.f32.mrf.mxu1  ;;  %v3406_v6 = vld [vmem:[#allocation2] sm:$0x1] }
 0x336   :  { %v3926_v19 = vadd.f32 %v3925_v35, %v3924_v38  ;;  %v3905_v54 = vpop.f32.mrf.mxu0  ;;  %v6514_v38 = vld [vmem:[#allocation17_spill] sm:$0xff] }
 0x337   :  { %v3039_v27 = vadd.f32 %v3904_v59, %v2999_v37  ;;  %v3927_v32 = vpop.f32.mrf.mxu1  ;;  %vm3405_vm8 = vcmp.eq.s32.totalorder %v6514_v38, 0 }
 0x338   :  { %v3906_v17 = vpop.f32.mrf.mxu0  ;;  %v3415_v32 = vld [vmem:[%s6276_s9] sm:$0x7]  ;;  %s4467_s9 = smov [#allocation9]  }
 0x339   :  { %v3079_v56 = vadd.f32 %v3926_v19, %v3039_v27  ;;  %v3928_v63 = vpop.f32.mrf.mxu1  ;;  %v3420_v17 = vstv %s3803_s8  ;;  %v3428_v4 = vmul.f32 %v3427_v53, %v3415_v32  ;;  %s3531_s3 = sshll.u32 %s4467_s9, 4  ;;  %s3532_s3 = int_to_ptr.vmem [resolvable:$true] %s3531_s3 }
 0x33a   :  { %v3417_v63 = vstv %s3416_s27  ;;  %s4433_s15 = scalar_lea.vmem %s3532_s3, 16  ;;  %s4437_s10 = scalar_lea.vmem %s3532_s3, 32 }
 0x33b   :  { %v3418_v57 = vmul.f32 %v3417_v63, %v3415_v32  ;;  %v3430_v11 = vrot.slane %v3428_v4, 2  ;;  %p4434_p1 = scmp.ne.s32.totalorder %s3532_s3, %s4433_s15  ;;  %p4438_p2 = scmp.lt.s32.totalorder %s3532_s3, %s3532_s3 }
 0x33c   :  { %p4439_p3 = scmp.lt.s32.totalorder %s4437_s10, %s4433_s15 }
 0x33e   :  { %p4440_p4 = por %p4439_p3, %p4438_p2 }
 0x340   :  { %p4441_p5 = pnand %p4440_p4, %p4434_p1 }
 0x352   :  { %v3946_v45 = vpop.f32.mrf.mxu0 }
 0x353   :  { %v3968_v14 = vpop.f32.mrf.mxu1 }
 0x354   :  { %v3947_v34 = vpop.f32.mrf.mxu0 }
 0x355   :  { %v3948_v3 = vadd.f32 %v3947_v34, %v3946_v45  ;;  %v3969_v0 = vpop.f32.mrf.mxu1 }
 0x356   :  { %v3970_v15 = vadd.f32 %v3969_v0, %v3968_v14  ;;  %v3949_v33 = vpop.f32.mrf.mxu0 }
 0x357   :  { %v3119_v24 = vadd.f32 %v3948_v3, %v3079_v56  ;;  %v3971_v58 = vpop.f32.mrf.mxu1  ;;  %v3421_v56 = vmul.f32 %v3420_v17, %v3415_v32 }
 0x358   :  { %v3950_v8 = vpop.f32.mrf.mxu0 }
 0x359   :  { %v3159_v20 = vadd.f32 %v3970_v15, %v3119_v24  ;;  %v3972_v50 = vpop.f32.mrf.mxu1  ;;  %v3423_v30 = vrot.slane %v3421_v56, 1 }
 0x35b   :  { %v3425_v5 = vadd.f32 %v3423_v30, %v3418_v57 }
 0x35d   :  { %v3432_v18 = vadd.f32 %v3430_v11, %v3425_v5 }
 0x35f   :  { %v3434_v45 = vadd.f32 %v3433_v23, %v3432_v18 }
 0x372   :  { %v3990_v31 = vpop.f32.mrf.mxu0 }
 0x373   :  { %v4012_v12 = vpop.f32.mrf.mxu1 }
 0x374   :  { %v3991_v41 = vpop.f32.mrf.mxu0 }
 0x375   :  { %v4013_v49 = vpop.f32.mrf.mxu1  ;;  %v3992_v26 = vadd.f32 %v3991_v41, %v3990_v31 }
 0x376   :  { %v3993_v9 = vpop.f32.mrf.mxu0  ;;  %v4014_v16 = vadd.f32 %v4013_v49, %v4012_v12 }
 0x377   :  { %v4015_v7 = vpop.f32.mrf.mxu1  ;;  %v3199_v61 = vadd.f32 %v3992_v26, %v3159_v20 }
 0x378   :  { %v3994_v28 = vpop.f32.mrf.mxu0 }
 0x379   :  { %v4016_v13 = vpop.f32.mrf.mxu1  ;;  %v3239_v2 = vadd.f32 %v4014_v16, %v3199_v61 }
 0x392   :  { %v4034_v22 = vpop.f32.mrf.mxu0 }
 0x393   :  { %v4056_v29 = vpop.f32.mrf.mxu1 }
 0x394   :  { %v4035_v52 = vpop.f32.mrf.mxu0 }
 0x395   :  { %v4057_v62 = vpop.f32.mrf.mxu1  ;;  %v4036_v1 = vadd.f32 %v4035_v52, %v4034_v22 }
 0x396   :  { %v4037_v21 = vpop.f32.mrf.mxu0  ;;  %v4058_v42 = vadd.f32 %v4057_v62, %v4056_v29 }
 0x397   :  { %v4059_v46 = vpop.f32.mrf.mxu1  ;;  %v3279_v39 = vadd.f32 %v4036_v1, %v3239_v2 }
 0x398   :  { %v4038_v47 = vpop.f32.mrf.mxu0 }
 0x399   :  { %v4060_v25 = vpop.f32.mrf.mxu1  ;;  %v3319_v40 = vadd.f32 %v4058_v42, %v3279_v39 }
 0x3b2   :  { %v4078_v48 = vpop.f32.mrf.mxu0 }
 0x3b3   :  { %v4100_v44 = vpop.f32.mrf.mxu1 }
 0x3b4   :  { %v4079_v51 = vpop.f32.mrf.mxu0 }
 0x3b5   :  { %v4080_v36 = vadd.f32 %v4079_v51, %v4078_v48  ;;  %v4101_v43 = vpop.f32.mrf.mxu1 }
 0x3b6   :  { %v4081_v55 = vpop.f32.mrf.mxu0  ;;  %v4102_v37 = vadd.f32 %v4101_v43, %v4100_v44 }
 0x3b7   :  { %v3359_v60 = vadd.f32 %v4080_v36, %v3319_v40  ;;  %v4103_v10 = vpop.f32.mrf.mxu1 }
 0x3b8   :  { %v4082_v59 = vpop.f32.mrf.mxu0 }
 0x3b9   :  { %v3399_v35 = vadd.f32 %v4102_v37, %v3359_v60  ;;  %v4104_v19 = vpop.f32.mrf.mxu1 }
 0x3bb   :  { %v3407_v54 = vsel %vm3405_vm8, %v3399_v35, %v3406_v6 }
 0x3bc   :  { %3409 = vst.msk [vmem:[#allocation2] sm:$0x1] %vm3408_vm0, %v3407_v54 }
 0x3c3   :  { %v3414_v27 = vld [vmem:[#allocation2] sm:$0x1] }
 0x3c4   :  { %4192 = vmatmul.mubr.msk.f32.vlgmr.msra.gmra.mxu0 %vm6515_vm7, %v3414_v27 }
 0x484   :  { %v3512_v14 = vpop.f32.mrf.mxu0 }
 0x485   :  { %v3513_v34 = vadd.f32 %v3512_v14, %v3434_v45 }
 0x486   :  { %v4193_v3 = vpop.f32.mrf.mxu0 }
 0x487   :  { %v3516_v0 = vmul.f32 %v3513_v34, %v3513_v34 }
 0x489   :  { %v3518_v15 = vsel %vm3517_vm15, %v3516_v0, 0.0 }
 0x48a   :  { %3519 = vadd.xlane.f32.xlu0 %v3518_v15 }
 0x513   :  { %v3520_v33 = vpop.xlane.xlu0 %3519 }
 0x514   :  { %v3521_v24 = vmax.f32 %v3520_v33, 1e-24 }
 0x516   :  { %4395 = vrsqrt.f32 %v3521_v24 }
 0x523   :  { %v4396_v58 = vpop.eup %4395 }
 0x524   :  { %v3523_v8 = vmul.f32 %v4396_v58, %v3513_v34 }
 0x526   :  { %3524 = vst.msk [vmem:[#allocation9] sm:$0x1] %vm3517_vm15, %v3523_v8 }
 0x527   :  { %4444 = shalt.err (!%p4441_p5)
}
 0x528   :  { %3534 = dma.vmem_to_hbm [thread:$0]  %s3532_s3, 16, %s6280_s13, [#allocation4]  }
 0x529   :  { %4457 = dma.done.wait [#allocation4], 16  }
 0x52a   :  { %4458 = vsyncadd [#allocation4], 4294967280 }
 0x52b   :  { %3538 = vsyncpa [#allocation4], 1 }
 0x52c   :  { %3539 = vsyncpa [#allocation5], 1 }
 0x52d   :  { %3540 = vsyncpa [#allocation7], 1 }

</bundles_post_ra>
